<compile_context>
chip_gen: v7x
topology: tpu7x:2x2x1
jax: 0.10.0
libtpu: 0.0.40
codegen_flags: <defaults>
</compile_context>

<pallas_src>
import jax
import jax.numpy as jnp
from jax.experimental import pallas as pl
from jax.experimental.pallas import tpu as pltpu

KSIZE = 3            # depthwise conv kernel size (padding="same")
PAD = KSIZE // 2     # 1-pixel halo
NPARAM = KSIZE * KSIZE + 3   # 9 taps + bias + BN scale + BN shift


def _residual_block_kernel(x_ref, p_ref, out_ref):
    """Fused depthwise-conv(3x3,'same') -> GELU -> BN -> +x for NB images.

    x_ref  : (NB, H, W, C)  input block (NHWC); also the residual stream
    p_ref  : (12, C)        rows 0..8: conv taps w[dh*3+dw]; row 9: conv bias;
                            row 10: BN scale; row 11: BN shift
    out_ref: (NB, H, W, C)
    """
    NB, H, W, C = out_ref.shape
    f32 = jnp.float32

    params = p_ref[...].astype(f32)          # (12, C) -- tiny

    x = x_ref[...]
    xc = x.astype(f32)

    # W-shifted taps via XLU sublane rolls + a one-column edge mask.
    # result[w] = x[w -/+ 1], out-of-bounds column -> 0 ("same" padding).
    wi = jax.lax.broadcasted_iota(jnp.int32, (W, 1), 0)   # broadcasts over (.., W, C)
    xm = jnp.where(wi == 0, 0.0, pltpu.roll(xc, shift=1, axis=2))          # x[.., w-1, :]
    xp = jnp.where(wi == W - 1, 0.0, pltpu.roll(xc, shift=W - 1, axis=2))  # x[.., w+1, :]

    # Per-source-row partial sums: r_k evaluated at source row s contributes
    # to output row s + (1 - k).  Conv bias folded into r1 (every output row
    # receives exactly one r1 term) -> no zero-init and no separate bias add.
    r0 = xm * params[0] + xc * params[1] + xp * params[2]
    r1 = xm * params[3] + xc * params[4] + xp * params[5] + params[9]
    r2 = xm * params[6] + xc * params[7] + xp * params[8]

    scale = params[10]
    shift = params[11]

    def _finish(pre, res):
        # GELU (tanh approximation -> EUP slot).
        # TODO(synk): PyTorch nn.GELU default is the exact erf variant.
        y = jax.nn.gelu(pre, approximate=True)
        return (y * scale + shift + res.astype(f32)).astype(out_ref.dtype)

    # H offsets are free outer-dim slices; top/bottom rows handled separately
    # so the big interior block needs neither padding nor row masking.
    out_ref[:, 1:H - 1] = _finish(
        r0[:, 0:H - 2] + r1[:, 1:H - 1] + r2[:, 2:H], x[:, 1:H - 1])
    out_ref[:, 0:1] = _finish(r1[:, 0:1] + r2[:, 1:2], x[:, 0:1])
    out_ref[:, H - 1:H] = _finish(
        r0[:, H - 2:H - 1] + r1[:, H - 1:H], x[:, H - 1:H])


def _plan_blocks(n, h, w, c, itemsize):
    """Pick images-per-block NB and a vmem_limit, generation-aware."""
    try:
        vmem_cap = pltpu.get_tpu_info().vmem_capacity_bytes
    except Exception:
        vmem_cap = 64 << 20                      # conservative (v7x-sized)
    big_vmem = vmem_cap >= (100 << 20)           # v5e/v6e (128 MiB) vs v7x (64 MiB)
    budget = (48 << 20) if big_vmem else (20 << 20)

    # Per-image VMEM estimate: double-buffered in + out I/O streams plus ~6
    # full-size f32 intermediates (xc, xm, xp, r0, r1, r2).
    per_img = (4 * itemsize + 6 * 4) * h * w * c
    fit = max(1, int(budget // per_img))
    cap = n if n == 1 else max(1, min(fit, n // 2))   # keep >= 2 grid steps
    divs = [d for d in range(1, n + 1) if n % d == 0 and d <= cap]
    even = [d for d in divs if (n // d) % 2 == 0]     # balance v7x's 2 TensorCores
    nb = max(even) if even else max(divs)

    limit_cap = (100 << 20) if big_vmem else (56 << 20)
    vmem_limit = int(min(max(nb * per_img + (2 << 20), 32 << 20), limit_cap))
    return nb, vmem_limit


@jax.jit
def residual_convmixer_nhwc(x, w_dw, conv_bias, bn_gamma, bn_beta, bn_mean,
                            bn_var, eps=1e-5):
    """fn(x) + x with fn = depthwise conv(3x3,'same') -> GELU -> BatchNorm2d.

    x    : (N, H, W, C)  NHWC activations (f32 or bf16; dtype preserved)
    w_dw : (C, K, K)     depthwise conv weight (per-channel 3x3)
    """
    N, H, W, C = x.shape
    assert H >= 3, "kernel assumes H >= 3 (true for any ConvMixer config)"
    itemsize = jnp.dtype(x.dtype).itemsize
    NB, vmem_limit = _plan_blocks(N, H, W, C, itemsize)

    # Parameter folding + packing into a single (12, C) stream (tiny, plain JAX).
    w_flat = w_dw.reshape(C, KSIZE * KSIZE).T.astype(jnp.float32)   # (9, C)
    scale = (bn_gamma / jnp.sqrt(bn_var + eps)).astype(jnp.float32)
    shift = (bn_beta - bn_mean * scale).astype(jnp.float32)
    params = jnp.concatenate(
        [w_flat,
         conv_bias.astype(jnp.float32)[None, :],
         scale[None, :],
         shift[None, :]], axis=0)                                   # (12, C)

    return pl.pallas_call(
        _residual_block_kernel,
        out_shape=jax.ShapeDtypeStruct((N, H, W, C), x.dtype),
        grid_spec=pltpu.PrefetchScalarGridSpec(
            num_scalar_prefetch=0,
            grid=(N // NB,),
            in_specs=[
                pl.BlockSpec((NB, H, W, C), lambda n: (n, 0, 0, 0)),
                pl.BlockSpec((NPARAM, C), lambda n: (0, 0)),
            ],
            out_specs=pl.BlockSpec((NB, H, W, C), lambda n: (n, 0, 0, 0)),
        ),
        compiler_params=pltpu.CompilerParams(
            dimension_semantics=("parallel",),
            vmem_limit_bytes=vmem_limit),
    )(x, params)


@jax.jit
def residual_convmixer(x_nchw, w_dw, conv_bias, bn_gamma, bn_beta, bn_mean,
                       bn_var, eps=1e-5):
    """NCHW entry point (PyTorch convention).

    NOTE: the two transposes below are pure layout plumbing; a NHWC-resident
    model should call `residual_convmixer_nhwc` directly and skip both HBM
    round trips.
    """
    x = jnp.transpose(x_nchw, (0, 2, 3, 1))                      # NCHW -> NHWC
    out = residual_convmixer_nhwc(x, w_dw, conv_bias, bn_gamma, bn_beta,
                                  bn_mean, bn_var, eps)
    return jnp.transpose(out, (0, 3, 1, 2))                      # NHWC -> NCHW


def _reference(x_nchw, w_dw, conv_bias, bn_gamma, bn_beta, bn_mean, bn_var,
               eps=1e-5):
    """Plain-JAX reference for the same fused residual block."""
    N, C, H, W = x_nchw.shape
    x = jnp.transpose(x_nchw, (0, 2, 3, 1))
    xpad = jnp.pad(x, ((0, 0), (PAD, PAD), (PAD, PAD), (0, 0)))
    acc = jnp.zeros((N, H, W, C), jnp.float32)
    for dw in range(KSIZE):
        for dh in range(KSIZE):
            acc = acc + xpad[:, dh:dh + H, dw:dw + W, :] * w_dw[:, dh, dw]
    acc = acc + conv_bias
    y = jax.nn.gelu(acc, approximate=True)
    scale = bn_gamma / jnp.sqrt(bn_var + eps)
    y = (y - bn_mean) * scale + bn_beta
    out = y + x
    return jnp.transpose(out, (0, 3, 1, 2))


if __name__ == "__main__":
    key = jax.random.PRNGKey(0)
    k_x, k_w, k_b, k_g, k_be, k_m, k_v = jax.random.split(key, 7)

    N, C, H, W = 2, 4, 16, 16
    x = jax.random.normal(k_x, (N, C, H, W), jnp.float32)

    # Deterministic synthetic parameters (shapes from ConvMixer's inner block).
    w_dw = jax.random.normal(k_w, (C, KSIZE, KSIZE), jnp.float32) * 0.1
    conv_bias = jax.random.normal(k_b, (C,), jnp.float32) * 0.1
    bn_gamma = 1.0 + 0.1 * jax.random.normal(k_g, (C,), jnp.float32)
    bn_beta = 0.1 * jax.random.normal(k_be, (C,), jnp.float32)
    bn_mean = 0.1 * jax.random.normal(k_m, (C,), jnp.float32)
    bn_var = jnp.abs(jax.random.normal(k_v, (C,), jnp.float32)) + 0.5

    out = residual_convmixer(x, w_dw, conv_bias, bn_gamma, bn_beta, bn_mean,
                             bn_var)
    out = jax.block_until_ready(out)

    ref = _reference(x, w_dw, conv_bias, bn_gamma, bn_beta, bn_mean, bn_var)
    assert out.shape == (N, C, H, W)
    assert jnp.allclose(out, ref, atol=1e-5, rtol=1e-5)

    print("KERNEL_OK")
</pallas_src>

<mosaic_0001>
module attributes {stable_mosaic.version = 11 : i64} {
  func.func @_residual_block_kernel(%arg0: i32, %arg1: memref<1x16x16x4xf32, #tpu.memory_space<vmem>>, %arg2: memref<12x4xf32, #tpu.memory_space<vmem>>, %arg3: memref<1x16x16x4xf32, #tpu.memory_space<vmem>>) attributes {dimension_semantics = [#tpu.dimension_semantics<parallel>], iteration_bounds = array<i64: 2>, scalar_prefetch = 0 : i64, scratch_operands = 0 : i64, tpu.core_type = #tpu.core_type<tc>, window_params = [{transform_indices = @transform_0, window_bounds = array<i64: 1, 16, 16, 4>}, {pipeline_mode = #tpu.pipeline_mode<synchronous>, transform_indices = @transform_1, window_bounds = array<i64: 12, 4>}, {transform_indices = @transform_2, window_bounds = array<i64: 1, 16, 16, 4>}]} {
    %c0 = arith.constant 0 : index
    %c0_0 = arith.constant 0 : index
    %0 = vector.load %arg2[%c0, %c0_0] : memref<12x4xf32, #tpu.memory_space<vmem>>, vector<12x4xf32>
    %c0_1 = arith.constant 0 : index
    %c0_2 = arith.constant 0 : index
    %c0_3 = arith.constant 0 : index
    %c0_4 = arith.constant 0 : index
    %1 = vector.load %arg1[%c0_1, %c0_2, %c0_3, %c0_4] : memref<1x16x16x4xf32, #tpu.memory_space<vmem>>, vector<1x16x16x4xf32>
    %2 = tpu.iota {dimensions = array<i32: 0>} : vector<16x1xi32>
    %c0_i32 = arith.constant 0 : i32
    %3 = vector.broadcast %c0_i32 : i32 to vector<16x1xi32>
    %4 = arith.cmpi eq, %2, %3 : vector<16x1xi32>
    %c1_i32 = arith.constant 1 : i32
    %5 = tpu.dynamic_rotate %1 by %c1_i32 dim 2 : vector<1x16x16x4xf32>, i32 -> vector<1x16x16x4xf32>
    %cst = arith.constant 0.000000e+00 : f32
    %6 = vector.shape_cast %4 : vector<16x1xi1> to vector<1x1x16x1xi1>
    %7 = vector.broadcast %6 : vector<1x1x16x1xi1> to vector<1x16x16x4xi1>
    %8 = vector.broadcast %cst : f32 to vector<1x16x16x4xf32>
    %9 = arith.select %7, %8, %5 : vector<1x16x16x4xi1>, vector<1x16x16x4xf32>
    %c15_i32 = arith.constant 15 : i32
    %10 = vector.broadcast %c15_i32 : i32 to vector<16x1xi32>
    %11 = arith.cmpi eq, %2, %10 : vector<16x1xi32>
    %c15_i32_5 = arith.constant 15 : i32
    %12 = tpu.dynamic_rotate %1 by %c15_i32_5 dim 2 : vector<1x16x16x4xf32>, i32 -> vector<1x16x16x4xf32>
    %cst_6 = arith.constant 0.000000e+00 : f32
    %13 = vector.shape_cast %11 : vector<16x1xi1> to vector<1x1x16x1xi1>
    %14 = vector.broadcast %13 : vector<1x1x16x1xi1> to vector<1x16x16x4xi1>
    %15 = vector.broadcast %cst_6 : f32 to vector<1x16x16x4xf32>
    %16 = arith.select %14, %15, %12 : vector<1x16x16x4xi1>, vector<1x16x16x4xf32>
    %17 = vector.extract_strided_slice %0 {offsets = [0, 0], sizes = [1, 4], strides = [1, 1]} : vector<12x4xf32> to vector<1x4xf32>
    %18 = vector.shape_cast %17 : vector<1x4xf32> to vector<4xf32>
    %19 = vector.shape_cast %18 : vector<4xf32> to vector<1x1x1x4xf32>
    %20 = vector.broadcast %19 : vector<1x1x1x4xf32> to vector<1x16x16x4xf32>
    %21 = arith.mulf %9, %20 : vector<1x16x16x4xf32>
    %22 = vector.extract_strided_slice %0 {offsets = [1, 0], sizes = [1, 4], strides = [1, 1]} : vector<12x4xf32> to vector<1x4xf32>
    %23 = vector.shape_cast %22 : vector<1x4xf32> to vector<4xf32>
    %24 = vector.shape_cast %23 : vector<4xf32> to vector<1x1x1x4xf32>
    %25 = vector.broadcast %24 : vector<1x1x1x4xf32> to vector<1x16x16x4xf32>
    %26 = arith.mulf %1, %25 : vector<1x16x16x4xf32>
    %27 = arith.addf %21, %26 : vector<1x16x16x4xf32>
    %28 = vector.extract_strided_slice %0 {offsets = [2, 0], sizes = [1, 4], strides = [1, 1]} : vector<12x4xf32> to vector<1x4xf32>
    %29 = vector.shape_cast %28 : vector<1x4xf32> to vector<4xf32>
    %30 = vector.shape_cast %29 : vector<4xf32> to vector<1x1x1x4xf32>
    %31 = vector.broadcast %30 : vector<1x1x1x4xf32> to vector<1x16x16x4xf32>
    %32 = arith.mulf %16, %31 : vector<1x16x16x4xf32>
    %33 = arith.addf %27, %32 : vector<1x16x16x4xf32>
    %34 = vector.extract_strided_slice %0 {offsets = [3, 0], sizes = [1, 4], strides = [1, 1]} : vector<12x4xf32> to vector<1x4xf32>
    %35 = vector.shape_cast %34 : vector<1x4xf32> to vector<4xf32>
    %36 = vector.shape_cast %35 : vector<4xf32> to vector<1x1x1x4xf32>
    %37 = vector.broadcast %36 : vector<1x1x1x4xf32> to vector<1x16x16x4xf32>
    %38 = arith.mulf %9, %37 : vector<1x16x16x4xf32>
    %39 = vector.extract_strided_slice %0 {offsets = [4, 0], sizes = [1, 4], strides = [1, 1]} : vector<12x4xf32> to vector<1x4xf32>
    %40 = vector.shape_cast %39 : vector<1x4xf32> to vector<4xf32>
    %41 = vector.shape_cast %40 : vector<4xf32> to vector<1x1x1x4xf32>
    %42 = vector.broadcast %41 : vector<1x1x1x4xf32> to vector<1x16x16x4xf32>
    %43 = arith.mulf %1, %42 : vector<1x16x16x4xf32>
    %44 = arith.addf %38, %43 : vector<1x16x16x4xf32>
    %45 = vector.extract_strided_slice %0 {offsets = [5, 0], sizes = [1, 4], strides = [1, 1]} : vector<12x4xf32> to vector<1x4xf32>
    %46 = vector.shape_cast %45 : vector<1x4xf32> to vector<4xf32>
    %47 = vector.shape_cast %46 : vector<4xf32> to vector<1x1x1x4xf32>
    %48 = vector.broadcast %47 : vector<1x1x1x4xf32> to vector<1x16x16x4xf32>
    %49 = arith.mulf %16, %48 : vector<1x16x16x4xf32>
    %50 = arith.addf %44, %49 : vector<1x16x16x4xf32>
    %51 = vector.extract_strided_slice %0 {offsets = [9, 0], sizes = [1, 4], strides = [1, 1]} : vector<12x4xf32> to vector<1x4xf32>
    %52 = vector.shape_cast %51 : vector<1x4xf32> to vector<4xf32>
    %53 = vector.shape_cast %52 : vector<4xf32> to vector<1x1x1x4xf32>
    %54 = vector.broadcast %53 : vector<1x1x1x4xf32> to vector<1x16x16x4xf32>
    %55 = arith.addf %50, %54 : vector<1x16x16x4xf32>
    %56 = vector.extract_strided_slice %0 {offsets = [6, 0], sizes = [1, 4], strides = [1, 1]} : vector<12x4xf32> to vector<1x4xf32>
    %57 = vector.shape_cast %56 : vector<1x4xf32> to vector<4xf32>
    %58 = vector.shape_cast %57 : vector<4xf32> to vector<1x1x1x4xf32>
    %59 = vector.broadcast %58 : vector<1x1x1x4xf32> to vector<1x16x16x4xf32>
    %60 = arith.mulf %9, %59 : vector<1x16x16x4xf32>
    %61 = vector.extract_strided_slice %0 {offsets = [7, 0], sizes = [1, 4], strides = [1, 1]} : vector<12x4xf32> to vector<1x4xf32>
    %62 = vector.shape_cast %61 : vector<1x4xf32> to vector<4xf32>
    %63 = vector.shape_cast %62 : vector<4xf32> to vector<1x1x1x4xf32>
    %64 = vector.broadcast %63 : vector<1x1x1x4xf32> to vector<1x16x16x4xf32>
    %65 = arith.mulf %1, %64 : vector<1x16x16x4xf32>
    %66 = arith.addf %60, %65 : vector<1x16x16x4xf32>
    %67 = vector.extract_strided_slice %0 {offsets = [8, 0], sizes = [1, 4], strides = [1, 1]} : vector<12x4xf32> to vector<1x4xf32>
    %68 = vector.shape_cast %67 : vector<1x4xf32> to vector<4xf32>
    %69 = vector.shape_cast %68 : vector<4xf32> to vector<1x1x1x4xf32>
    %70 = vector.broadcast %69 : vector<1x1x1x4xf32> to vector<1x16x16x4xf32>
    %71 = arith.mulf %16, %70 : vector<1x16x16x4xf32>
    %72 = arith.addf %66, %71 : vector<1x16x16x4xf32>
    %73 = vector.extract_strided_slice %0 {offsets = [10, 0], sizes = [1, 4], strides = [1, 1]} : vector<12x4xf32> to vector<1x4xf32>
    %74 = vector.shape_cast %73 : vector<1x4xf32> to vector<4xf32>
    %75 = vector.extract_strided_slice %0 {offsets = [11, 0], sizes = [1, 4], strides = [1, 1]} : vector<12x4xf32> to vector<1x4xf32>
    %76 = vector.shape_cast %75 : vector<1x4xf32> to vector<4xf32>
    %77 = vector.extract_strided_slice %33 {offsets = [0, 0, 0, 0], sizes = [1, 14, 16, 4], strides = [1, 1, 1, 1]} : vector<1x16x16x4xf32> to vector<1x14x16x4xf32>
    %78 = vector.extract_strided_slice %55 {offsets = [0, 1, 0, 0], sizes = [1, 14, 16, 4], strides = [1, 1, 1, 1]} : vector<1x16x16x4xf32> to vector<1x14x16x4xf32>
    %79 = arith.addf %77, %78 : vector<1x14x16x4xf32>
    %80 = vector.extract_strided_slice %72 {offsets = [0, 2, 0, 0], sizes = [1, 14, 16, 4], strides = [1, 1, 1, 1]} : vector<1x16x16x4xf32> to vector<1x14x16x4xf32>
    %81 = arith.addf %79, %80 : vector<1x14x16x4xf32>
    %82 = vector.extract_strided_slice %1 {offsets = [0, 1, 0, 0], sizes = [1, 14, 16, 4], strides = [1, 1, 1, 1]} : vector<1x16x16x4xf32> to vector<1x14x16x4xf32>
    %83 = arith.mulf %81, %81 : vector<1x14x16x4xf32>
    %84 = arith.mulf %81, %83 : vector<1x14x16x4xf32>
    %cst_7 = arith.constant 4.471500e-02 : f32
    %85 = vector.broadcast %cst_7 : f32 to vector<1x14x16x4xf32>
    %86 = arith.mulf %85, %84 : vector<1x14x16x4xf32>
    %87 = arith.addf %81, %86 : vector<1x14x16x4xf32>
    %cst_8 = arith.constant 0.797884583 : f32
    %88 = vector.broadcast %cst_8 : f32 to vector<1x14x16x4xf32>
    %89 = arith.mulf %88, %87 : vector<1x14x16x4xf32>
    %90 = math.tanh %89 : vector<1x14x16x4xf32>
    %cst_9 = arith.constant 1.000000e+00 : f32
    %91 = vector.broadcast %cst_9 : f32 to vector<1x14x16x4xf32>
    %92 = arith.addf %91, %90 : vector<1x14x16x4xf32>
    %cst_10 = arith.constant 5.000000e-01 : f32
    %93 = vector.broadcast %cst_10 : f32 to vector<1x14x16x4xf32>
    %94 = arith.mulf %93, %92 : vector<1x14x16x4xf32>
    %95 = arith.mulf %81, %94 : vector<1x14x16x4xf32>
    %96 = vector.shape_cast %74 : vector<4xf32> to vector<1x1x1x4xf32>
    %97 = vector.broadcast %96 : vector<1x1x1x4xf32> to vector<1x14x16x4xf32>
    %98 = arith.mulf %95, %97 : vector<1x14x16x4xf32>
    %99 = vector.shape_cast %76 : vector<4xf32> to vector<1x1x1x4xf32>
    %100 = vector.broadcast %99 : vector<1x1x1x4xf32> to vector<1x14x16x4xf32>
    %101 = arith.addf %98, %100 : vector<1x14x16x4xf32>
    %102 = arith.addf %101, %82 : vector<1x14x16x4xf32>
    %c0_11 = arith.constant 0 : index
    %c1 = arith.constant 1 : index
    %c0_12 = arith.constant 0 : index
    %c0_13 = arith.constant 0 : index
    %103 = vector.load %arg3[%c0_11, %c1, %c0_12, %c0_13] : memref<1x16x16x4xf32, #tpu.memory_space<vmem>>, vector<1x14x16x4xf32>
    tpu.vector_store %arg3[%c0_11, %c1, %c0_12, %c0_13], %102 {strides = array<i32>} : memref<1x16x16x4xf32, #tpu.memory_space<vmem>>, vector<1x14x16x4xf32>,
    %104 = vector.extract_strided_slice %55 {offsets = [0, 0, 0, 0], sizes = [1, 1, 16, 4], strides = [1, 1, 1, 1]} : vector<1x16x16x4xf32> to vector<1x1x16x4xf32>
    %105 = vector.extract_strided_slice %72 {offsets = [0, 1, 0, 0], sizes = [1, 1, 16, 4], strides = [1, 1, 1, 1]} : vector<1x16x16x4xf32> to vector<1x1x16x4xf32>
    %106 = arith.addf %104, %105 : vector<1x1x16x4xf32>
    %107 = vector.extract_strided_slice %1 {offsets = [0, 0, 0, 0], sizes = [1, 1, 16, 4], strides = [1, 1, 1, 1]} : vector<1x16x16x4xf32> to vector<1x1x16x4xf32>
    %108 = arith.mulf %106, %106 : vector<1x1x16x4xf32>
    %109 = arith.mulf %106, %108 : vector<1x1x16x4xf32>
    %cst_14 = arith.constant 4.471500e-02 : f32
    %110 = vector.broadcast %cst_14 : f32 to vector<1x1x16x4xf32>
    %111 = arith.mulf %110, %109 : vector<1x1x16x4xf32>
    %112 = arith.addf %106, %111 : vector<1x1x16x4xf32>
    %cst_15 = arith.constant 0.797884583 : f32
    %113 = vector.broadcast %cst_15 : f32 to vector<1x1x16x4xf32>
    %114 = arith.mulf %113, %112 : vector<1x1x16x4xf32>
    %115 = math.tanh %114 : vector<1x1x16x4xf32>
    %cst_16 = arith.constant 1.000000e+00 : f32
    %116 = vector.broadcast %cst_16 : f32 to vector<1x1x16x4xf32>
    %117 = arith.addf %116, %115 : vector<1x1x16x4xf32>
    %cst_17 = arith.constant 5.000000e-01 : f32
    %118 = vector.broadcast %cst_17 : f32 to vector<1x1x16x4xf32>
    %119 = arith.mulf %118, %117 : vector<1x1x16x4xf32>
    %120 = arith.mulf %106, %119 : vector<1x1x16x4xf32>
    %121 = vector.shape_cast %74 : vector<4xf32> to vector<1x1x1x4xf32>
    %122 = vector.broadcast %121 : vector<1x1x1x4xf32> to vector<1x1x16x4xf32>
    %123 = arith.mulf %120, %122 : vector<1x1x16x4xf32>
    %124 = vector.shape_cast %76 : vector<4xf32> to vector<1x1x1x4xf32>
    %125 = vector.broadcast %124 : vector<1x1x1x4xf32> to vector<1x1x16x4xf32>
    %126 = arith.addf %123, %125 : vector<1x1x16x4xf32>
    %127 = arith.addf %126, %107 : vector<1x1x16x4xf32>
    %c0_18 = arith.constant 0 : index
    %c0_19 = arith.constant 0 : index
    %c0_20 = arith.constant 0 : index
    %c0_21 = arith.constant 0 : index
    %128 = vector.load %arg3[%c0_18, %c0_19, %c0_20, %c0_21] : memref<1x16x16x4xf32, #tpu.memory_space<vmem>>, vector<1x1x16x4xf32>
    tpu.vector_store %arg3[%c0_18, %c0_19, %c0_20, %c0_21], %127 {strides = array<i32>} : memref<1x16x16x4xf32, #tpu.memory_space<vmem>>, vector<1x1x16x4xf32>,
    %129 = vector.extract_strided_slice %33 {offsets = [0, 14, 0, 0], sizes = [1, 1, 16, 4], strides = [1, 1, 1, 1]} : vector<1x16x16x4xf32> to vector<1x1x16x4xf32>
    %130 = vector.extract_strided_slice %55 {offsets = [0, 15, 0, 0], sizes = [1, 1, 16, 4], strides = [1, 1, 1, 1]} : vector<1x16x16x4xf32> to vector<1x1x16x4xf32>
    %131 = arith.addf %129, %130 : vector<1x1x16x4xf32>
    %132 = vector.extract_strided_slice %1 {offsets = [0, 15, 0, 0], sizes = [1, 1, 16, 4], strides = [1, 1, 1, 1]} : vector<1x16x16x4xf32> to vector<1x1x16x4xf32>
    %133 = arith.mulf %131, %131 : vector<1x1x16x4xf32>
    %134 = arith.mulf %131, %133 : vector<1x1x16x4xf32>
    %cst_22 = arith.constant 4.471500e-02 : f32
    %135 = vector.broadcast %cst_22 : f32 to vector<1x1x16x4xf32>
    %136 = arith.mulf %135, %134 : vector<1x1x16x4xf32>
    %137 = arith.addf %131, %136 : vector<1x1x16x4xf32>
    %cst_23 = arith.constant 0.797884583 : f32
    %138 = vector.broadcast %cst_23 : f32 to vector<1x1x16x4xf32>
    %139 = arith.mulf %138, %137 : vector<1x1x16x4xf32>
    %140 = math.tanh %139 : vector<1x1x16x4xf32>
    %cst_24 = arith.constant 1.000000e+00 : f32
    %141 = vector.broadcast %cst_24 : f32 to vector<1x1x16x4xf32>
    %142 = arith.addf %141, %140 : vector<1x1x16x4xf32>
    %cst_25 = arith.constant 5.000000e-01 : f32
    %143 = vector.broadcast %cst_25 : f32 to vector<1x1x16x4xf32>
    %144 = arith.mulf %143, %142 : vector<1x1x16x4xf32>
    %145 = arith.mulf %131, %144 : vector<1x1x16x4xf32>
    %146 = vector.shape_cast %74 : vector<4xf32> to vector<1x1x1x4xf32>
    %147 = vector.broadcast %146 : vector<1x1x1x4xf32> to vector<1x1x16x4xf32>
    %148 = arith.mulf %145, %147 : vector<1x1x16x4xf32>
    %149 = vector.shape_cast %76 : vector<4xf32> to vector<1x1x1x4xf32>
    %150 = vector.broadcast %149 : vector<1x1x1x4xf32> to vector<1x1x16x4xf32>
    %151 = arith.addf %148, %150 : vector<1x1x16x4xf32>
    %152 = arith.addf %151, %132 : vector<1x1x16x4xf32>
    %c0_26 = arith.constant 0 : index
    %c15 = arith.constant 15 : index
    %c0_27 = arith.constant 0 : index
    %c0_28 = arith.constant 0 : index
    %153 = vector.load %arg3[%c0_26, %c15, %c0_27, %c0_28] : memref<1x16x16x4xf32, #tpu.memory_space<vmem>>, vector<1x1x16x4xf32>
    tpu.vector_store %arg3[%c0_26, %c15, %c0_27, %c0_28], %152 {strides = array<i32>} : memref<1x16x16x4xf32, #tpu.memory_space<vmem>>, vector<1x1x16x4xf32>,
    return
  }
  func.func @transform_0(%arg0: i32) -> (i32, i32, i32, i32) {
    %c0_i32 = arith.constant 0 : i32
    %c0_i32_0 = arith.constant 0 : i32
    %c0_i32_1 = arith.constant 0 : i32
    %c0_i32_2 = arith.constant 0 : i32
    return %arg0, %c0_i32, %c0_i32_0, %c0_i32_1 : i32, i32, i32, i32
  }
  func.func @transform_1(%arg0: i32) -> (i32, i32) {
    %c0_i32 = arith.constant 0 : i32
    %c0_i32_0 = arith.constant 0 : i32
    %c0_i32_1 = arith.constant 0 : i32
    return %c0_i32, %c0_i32_0 : i32, i32
  }
  func.func @transform_2(%arg0: i32) -> (i32, i32, i32, i32) {
    %c0_i32 = arith.constant 0 : i32
    %c0_i32_0 = arith.constant 0 : i32
    %c0_i32_1 = arith.constant 0 : i32
    %c0_i32_2 = arith.constant 0 : i32
    return %arg0, %c0_i32, %c0_i32_0, %c0_i32_1 : i32, i32, i32, i32
  }
}

</mosaic_0001>

<bundles_post_ra>
// kernel: residual_convmixer_nhwc.1
= control target key start
LH: loop header
LB: loop body
LE: loop exit
PB: predicated region body
PF: predicated region fallthrough
CT: control target
= control target key end

     0   :  { %s1602_s9 = smov 0   ;;  %s3120_s0 = inlined_call_operand.vmem [shape: f32[2,16,16,4], index: 0, kind: input, shape index: {}]   ;;  %s3121_s1 = inlined_call_operand.vmem [shape: f32[12,4], index: 1, kind: input, shape index: {}]   ;;  %s3122_s2 = inlined_call_operand.vmem [shape: f32[2,16,16,4], index: 2, kind: output, shape index: {}]  }
   0x1 LB: > { %s1461_s10 = sadd.s32 4294967295, %s1585_s9   ;;  %p1465_p0 = scmp.ge.s32.totalorder %s1585_s9, 1  ;;  %s1585_s9 = sphi %s1602_s9, %s12_s9  }
   0x2   : > { %p112_p1 = scmp.lt.s32.totalorder %s1585_s9, 3 }
   0x4   : > { %p113_p2 = pnand %p1465_p0, %p112_p1 }
   0x6   : > { %116 = sbr.rel (%p113_p2) target bundleno = 325 (0x145), region = 28 }
   0xd   : > { %p134_p3 = scmp.lt.s32.totalorder %s1461_s10, 1  ;;  %v178_v0 = vlaneseq  ;;  %v144_v3 = vld [vmem:[%s3121_s1] sm:$0xff]  ;;  %v145_v36 = vld [vmem:[%s3121_s1 + $0x8] sm:$0xf]  ;;  %vm1320_vm4 = vcmask 31744  }
   0xf   : > { %s3136_s10 = smov (!%p134_p3, %s1461_s10), 1  ;;  %v1612_v1 = vshrl.u32 %v178_v0, 7 }
  0x10   : > { %s1502_s11 = sshll.u32 %s3136_s10, 8 }
  0x11   : > { %v1616_v2 = vadd.s32 8, %v1612_v1  ;;  %vm181_vm0 = vcmp.eq.s32.totalorder %v1612_v1, 0  ;;  %vm215_vm1 = vcmp.lt.s32.totalorder %v1612_v1, 1  ;;  %vm318_vm2 = vcmp.lt.s32.totalorder %v1612_v1, 7  ;;  %s1626_s14 = scalar_lea.vmem %s3120_s0, %s1502_s11  ;;  %s1983_s21 = scalar_lea.vmem %s3122_s2, %s1502_s11 }
  0x12   : > { %v389_v4 = vsub.s32 0, %v1612_v1  ;;  %v423_v5 = vsub.s32 1, %v1612_v1  ;;  %v487_v6 = vsub.s32 2, %v1612_v1  ;;  %v551_v7 = vsub.s32 3, %v1612_v1  ;;  %v1636_v8 = vld [vmem:[%s1626_s14] sm:$0xff]  ;;  %v1639_v9 = vld [vmem:[%s1626_s14 + $0x8] sm:$0xff] }
  0x13   : > { %v1642_v10 = vld [vmem:[%s1626_s14 + $0x10] sm:$0xff]  ;;  %vm285_vm3 = vcmp.eq.s32.totalorder %v1616_v2, 15  ;;  %v587_v11 = vsub.s32 4, %v1612_v1  ;;  %v655_v12 = vsub.s32 5, %v1612_v1  ;;  %v1648_v13 = vld [vmem:[%s1626_s14 + $0x18] sm:$0xff]  ;;  %v1651_v14 = vld [vmem:[%s1626_s14 + $0x20] sm:$0xff] }
  0x14   : > { %v1654_v15 = vld [vmem:[%s1626_s14 + $0x28] sm:$0xff]  ;;  %v183_v16 = vrot.slane %v1636_v8, 7  ;;  %v184_v17 = vrot.slane %v1642_v10, 7  ;;  %v199_v18 = vrot.slane %v1639_v9, 7  ;;  %v1659_v19 = vrot.slane %v144_v3, %v389_v4 }
  0x15   : > { %v185_v20 = vrot.slane %v1651_v14, 7  ;;  %v200_v21 = vrot.slane %v1648_v13, 7  ;;  %v201_v22 = vrot.slane %v1654_v15, 7  ;;  %v286_v23 = vrot.slane %v1636_v8, 1 }
  0x16   : > { %v232_v24 = vsel %vm215_vm1, %v199_v18, %v183_v16  ;;  %v287_v25 = vrot.slane %v1642_v10, 1  ;;  %v288_v26 = vrot.slane %v1651_v14, 1  ;;  %v302_v27 = vrot.slane %v1639_v9, 1 }
  0x17   : > { %v1672_v28 = vsel %vm215_vm1, %v184_v17, %v200_v21  ;;  %v233_v29 = vsel %vm215_vm1, %v200_v21, %v184_v17  ;;  %v234_v30 = vsel %vm215_vm1, %v201_v22, %v185_v20  ;;  %v1680_v31 = vsel %vm181_vm0, 0.0, %v232_v24 }
  0x18   : > { %3127 = vst [vmem:[#allocation2_spill] sm:$0xff] %v1672_v28  ;;  %v1684_v32 = vsel %vm181_vm0, 0.0, %v233_v29  ;;  %v1688_v33 = vsel %vm181_vm0, 0.0, %v234_v30  ;;  %v303_v34 = vrot.slane %v1648_v13, 1  ;;  %v304_v35 = vrot.slane %v1654_v15, 1 }
  0x19   : > { %v1697_v37 = vsel %vm318_vm2, %v286_v23, %v302_v27  ;;  %v391_v38 = vmul.f32 %v1659_v19, %v1680_v31  ;;  %v1701_v39 = vrot.slane %v144_v3, %v423_v5  ;;  %v1703_v40 = vrot.slane %v144_v3, %v487_v6 }
  0x1a   : > { %v1707_v41 = vsel %vm318_vm2, %v287_v25, %v303_v34  ;;  %v1711_v42 = vsel %vm318_vm2, %v288_v26, %v304_v35  ;;  %v336_v43 = vsel %vm318_vm2, %v303_v34, %v287_v25  ;;  %v1715_v44 = vrot.slane %v144_v3, %v551_v7  ;;  %v1790_v25 = vld [vmem:[%s1626_s14 + $0x30] sm:$0xff] }
  0x1b   : > { %v1719_v45 = vsel %vm285_vm3, 0.0, %v336_v43  ;;  %v425_v46 = vmul.f32 %v1701_v39, %v1636_v8  ;;  %v427_v47 = vmul.f32 %v1701_v39, %v1642_v10  ;;  %v489_v48 = vmul.f32 %v1703_v40, %v1697_v37 }
  0x1c   : > { %3128 = vst [vmem:[#allocation3_spill] sm:$0xff] %v1719_v45  ;;  %v555_v49 = vmul.f32 %v1715_v44, %v1684_v32  ;;  %v1729_v50 = vrot.slane %v144_v3, %v587_v11  ;;  %v1731_v51 = vrot.slane %v144_v3, %v655_v12  ;;  %v1733_v52 = vrot.slane %v145_v36, %v423_v5 }
  0x1d   : > { %v455_v53 = vadd.f32 %v425_v46, %v391_v38  ;;  %v759_v54 = vsub.s32 6, %v1612_v1  ;;  %v793_v55 = vsub.s32 7, %v1612_v1  ;;  %v1737_v56 = vrot.slane %v145_v36, %v389_v4 }
  0x1e   : > { %v591_v57 = vmul.f32 %v1729_v50, %v1642_v10  ;;  %v659_v58 = vmul.f32 %v1731_v51, %v1707_v41  ;;  %v1743_v59 = vrot.slane %v145_v36, %v487_v6  ;;  %v1745_v60 = vrot.slane %v145_v36, %v551_v7 }
  0x1f   : > { %v519_v61 = vadd.f32 %v489_v48, %v455_v53  ;;  %v1747_v62 = vrot.slane %v144_v3, %v759_v54  ;;  %v1749_v63 = vrot.slane %v144_v3, %v793_v55  ;;  %v861_v0 = vmul.f32 %v1737_v56, %v1711_v42 }
  0x20   : > { %v623_v4 = vadd.f32 %v591_v57, %v555_v49  ;;  %v1755_v5 = vsel %vm215_vm1, %v183_v16, %v199_v18  ;;  %v1759_v6 = vsel %vm215_vm1, %v185_v20, %v201_v22  ;;  %v335_v7 = vsel %vm318_vm2, %v302_v27, %v286_v23 }
  0x21   : > { %3129 = vst [vmem:[#allocation4_spill] sm:$0xff] %v1755_v5  ;;  %v763_v3 = vmul.f32 %v1747_v62, %v1688_v33  ;;  %v1767_v8 = vmul.f32 %v1749_v63, %v1642_v10  ;;  %v797_v11 = vmul.f32 %v1749_v63, %v1651_v14  ;;  %v337_v12 = vsel %vm318_vm2, %v304_v35, %v288_v26  ;;  %v1793_v26 = vld [vmem:[%s1626_s14 + $0x38] sm:$0xff] }
  0x22   : > { %v691_v16 = vadd.f32 %v659_v58, %v623_v4  ;;  %v1775_v17 = vsel %vm285_vm3, 0.0, %v335_v7  ;;  %v1779_v18 = vsel %vm285_vm3, 0.0, %v337_v12  ;;  %v392_v20 = vmul.f32 %v1659_v19, %v1755_v5 }
  0x23   : > { %3130 = vst [vmem:[#allocation5_spill] sm:$0xff] %v1775_v17  ;;  %v827_v21 = vadd.f32 %v797_v11, %v763_v3  ;;  %v426_v22 = vmul.f32 %v1701_v39, %v1639_v9  ;;  %v490_v23 = vmul.f32 %v1703_v40, %v1775_v17  ;;  %v556_v24 = vmul.f32 %v1715_v44, %v1672_v28 }
  0x24   : > { %v727_v27 = vadd.f32 %v1733_v52, %v691_v16  ;;  %v592_v29 = vmul.f32 %v1729_v50, %v1648_v13  ;;  %v660_v30 = vmul.f32 %v1731_v51, %v1719_v45  ;;  %v764_v9 = vmul.f32 %v1747_v62, %v1759_v6 }
  0x25   : > { %v891_v34 = vadd.f32 %v861_v0, %v827_v21  ;;  %v456_v35 = vadd.f32 %v426_v22, %v392_v20  ;;  %v798_v36 = vmul.f32 %v1749_v63, %v1654_v15  ;;  %v862_v38 = vmul.f32 %v1737_v56, %v1779_v18 }
  0x26   : > { %v919_v43 = vadd.f32 %v727_v27, %v519_v61  ;;  %v624_v46 = vadd.f32 %v592_v29, %v556_v24  ;;  %v186_v48 = vrot.slane %v1790_v25, 7  ;;  %v202_v49 = vrot.slane %v1793_v26, 7 }
  0x27   : > { %v520_v53 = vadd.f32 %v490_v23, %v456_v35  ;;  %v828_v54 = vadd.f32 %v798_v36, %v764_v9  ;;  %v289_v55 = vrot.slane %v1790_v25, 1  ;;  %v305_v57 = vrot.slane %v1793_v26, 1 }
  0x28   : > { %v1810_v58 = vadd.f32 %v919_v43, %v891_v34  ;;  %v692_v0 = vadd.f32 %v660_v30, %v624_v46  ;;  %v235_v4 = vsel %vm215_vm1, %v202_v49, %v186_v48  ;;  %v393_v61 = vmul.f32 %v1659_v19, %v1684_v32 }
  0x29   : > { %v892_v7 = vadd.f32 %v862_v38, %v828_v54  ;;  %v1818_v3 = vsel %vm181_vm0, 0.0, %v235_v4  ;;  %v1822_v11 = vsel %vm318_vm2, %v289_v55, %v305_v57  ;;  %v491_v12 = vmul.f32 %v1703_v40, %v1707_v41 }
  0x2a   : > { %v975_v16 = vmul.f32 %v1810_v58, %v1810_v58  ;;  %v728_v20 = vadd.f32 %v1733_v52, %v692_v0  ;;  %v457_v21 = vadd.f32 %v427_v47, %v393_v61  ;;  %v557_v22 = vmul.f32 %v1715_v44, %v1688_v33 }
  0x2b   : > { %v593_v23 = vmul.f32 %v1729_v50, %v1651_v14  ;;  %v661_v24 = vmul.f32 %v1731_v51, %v1711_v42  ;;  %v765_v27 = vmul.f32 %v1747_v62, %v1818_v3  ;;  %v799_v29 = vmul.f32 %v1749_v63, %v1790_v25 }
  0x2c   : > { %v1003_v30 = vmul.f32 %v975_v16, %v1810_v58  ;;  %v920_v9 = vadd.f32 %v728_v20, %v520_v53  ;;  %v521_v34 = vadd.f32 %v491_v12, %v457_v21  ;;  %v863_v47 = vmul.f32 %v1737_v56, %v1822_v11  ;;  %v1868_v16 = vld [vmem:[%s1626_s14 + $0x40] sm:$0xff] }
  0x2d   : > { %v625_v35 = vadd.f32 %v593_v23, %v557_v22  ;;  %v829_v36 = vadd.f32 %v799_v29, %v765_v27  ;;  %v1844_v38 = vsel %vm215_vm1, %v186_v48, %v202_v49  ;;  %v338_v43 = vsel %vm318_vm2, %v305_v57, %v289_v55 }
  0x2e   : > { %v1031_v46 = vmul.f32 0.044715, %v1003_v30  ;;  %v1848_v54 = vadd.f32 %v920_v9, %v892_v7  ;;  %v1852_v53 = vsel %vm285_vm3, 0.0, %v338_v43  ;;  %v394_v0 = vmul.f32 %v1659_v19, %v1672_v28  ;;  %v1879_v9 = vld [vmem:[%s1626_s14 + $0x48] sm:$0xff] }
  0x2f   : > { %v693_v4 = vadd.f32 %v661_v24, %v625_v35  ;;  %v893_v61 = vadd.f32 %v863_v47, %v829_v36  ;;  %v428_v48 = vmul.f32 %v1701_v39, %v1648_v13  ;;  %v492_v49 = vmul.f32 %v1703_v40, %v1719_v45 }
  0x30   : > { %v1059_v55 = vadd.f32 %v1031_v46, %v1810_v58  ;;  %v976_v57 = vmul.f32 %v1848_v54, %v1848_v54  ;;  %v558_v7 = vmul.f32 %v1715_v44, %v1759_v6  ;;  %v594_v12 = vmul.f32 %v1729_v50, %v1654_v15 }
  0x31   : > { %v729_v20 = vadd.f32 %v1733_v52, %v693_v4  ;;  %v458_v21 = vadd.f32 %v428_v48, %v394_v0  ;;  %v662_v22 = vmul.f32 %v1731_v51, %v1779_v18  ;;  %v766_v23 = vmul.f32 %v1747_v62, %v1844_v38 }
  0x32   : > { %v1087_v24 = vmul.f32 0.7978846, %v1059_v55  ;;  %v1004_v27 = vmul.f32 %v976_v57, %v1848_v54  ;;  %v626_v29 = vadd.f32 %v594_v12, %v558_v7  ;;  %v800_v30 = vmul.f32 %v1749_v63, %v1793_v26 }
  0x33   : > { %v921_v47 = vadd.f32 %v729_v20, %v521_v34  ;;  %v522_v35 = vadd.f32 %v492_v49, %v458_v21  ;;  %v864_v36 = vmul.f32 %v1737_v56, %v1852_v53  ;;  %v187_v43 = vrot.slane %v1868_v16, 7 }
  0x34   : > { %1512 = vtanh.f32 %v1087_v24  ;;  %v1032_v46 = vmul.f32 0.044715, %v1004_v27  ;;  %v694_v0 = vadd.f32 %v662_v22, %v626_v29  ;;  %v830_v4 = vadd.f32 %v800_v30, %v766_v23 }
  0x35   : > { %v1884_v48 = vadd.f32 %v921_v47, %v893_v61  ;;  %v203_v55 = vrot.slane %v1879_v9, 7  ;;  %v290_v57 = vrot.slane %v1868_v16, 1  ;;  %v306_v7 = vrot.slane %v1879_v9, 1 }
  0x36   : > { %v1060_v34 = vadd.f32 %v1032_v46, %v1848_v54  ;;  %v730_v49 = vadd.f32 %v1733_v52, %v694_v0  ;;  %v894_v12 = vadd.f32 %v864_v36, %v830_v4  ;;  %v395_v20 = vmul.f32 %v1659_v19, %v1688_v33 }
  0x37   : > { %v977_v21 = vmul.f32 %v1884_v48, %v1884_v48  ;;  %v236_v61 = vsel %vm215_vm1, %v203_v55, %v187_v43  ;;  %v1899_v22 = vsel %vm318_vm2, %v290_v57, %v306_v7  ;;  %v429_v23 = vmul.f32 %v1701_v39, %v1651_v14 }
  0x38   : > { %v1088_v24 = vmul.f32 0.7978846, %v1060_v34  ;;  %v922_v27 = vadd.f32 %v730_v49, %v522_v35  ;;  %v1905_v29 = vsel %vm181_vm0, 0.0, %v236_v61  ;;  %v493_v33 = vmul.f32 %v1703_v40, %v1711_v42 }
  0x39   : > { %v1005_v30 = vmul.f32 %v977_v21, %v1884_v48  ;;  %v459_v47 = vadd.f32 %v429_v23, %v395_v20  ;;  %v559_v36 = vmul.f32 %v1715_v44, %v1818_v3  ;;  %v595_v46 = vmul.f32 %v1729_v50, %v1790_v25 }
  0x3a   : > { %1514 = vtanh.f32 %v1088_v24  ;;  %v1914_v0 = vadd.f32 %v922_v27, %v894_v12  ;;  %v663_v35 = vmul.f32 %v1731_v51, %v1822_v11  ;;  %v767_v4 = vmul.f32 %v1747_v62, %v1905_v29 }
  0x3b   : > { %v1033_v34 = vmul.f32 0.044715, %v1005_v30  ;;  %v523_v42 = vadd.f32 %v493_v33, %v459_v47  ;;  %v627_v49 = vadd.f32 %v595_v46, %v559_v36  ;;  %v801_v20 = vmul.f32 %v1749_v63, %v1868_v16 }
  0x3c   : > { %v978_v21 = vmul.f32 %v1914_v0, %v1914_v0  ;;  %v865_v61 = vmul.f32 %v1737_v56, %v1899_v22  ;;  %v1928_v12 = vsel %vm215_vm1, %v187_v43, %v203_v55  ;;  %v339_v23 = vsel %vm318_vm2, %v306_v7, %v290_v57 }
  0x3d   : > { %v1061_v24 = vadd.f32 %v1033_v34, %v1884_v48  ;;  %v695_v27 = vadd.f32 %v663_v35, %v627_v49  ;;  %v831_v33 = vadd.f32 %v801_v20, %v767_v4  ;;  %v1935_v30 = vsel %vm285_vm3, 0.0, %v339_v23 }
  0x3e   : > { %v1513_v47 = vpop.eup %1512  ;;  %v1006_v36 = vmul.f32 %v978_v21, %v1914_v0  ;;  %v396_v46 = vmul.f32 %v1659_v19, %v1759_v6  ;;  %v430_v43 = vmul.f32 %v1701_v39, %v1654_v15  ;;  %v494_v55 = vmul.f32 %v1703_v40, %v1779_v18 }
  0x3f   : > { %v1143_v57 = vadd.f32 1.0, %v1513_v47  ;;  %v1089_v7 = vmul.f32 0.7978846, %v1061_v24  ;;  %v731_v35 = vadd.f32 %v1733_v52, %v695_v27  ;;  %v895_v4 = vadd.f32 %v865_v61, %v831_v33  ;;  %v1952_v47 = vld [vmem:[%s1626_s14 + $0x50] sm:$0xff]  ;;  %v1955_v24 = vld [vmem:[%s1626_s14 + $0x58] sm:$0xff] }
  0x40   : > { %v1034_v34 = vmul.f32 0.044715, %v1006_v36  ;;  %v460_v49 = vadd.f32 %v430_v43, %v396_v46  ;;  %v560_v20 = vmul.f32 %v1715_v44, %v1844_v38  ;;  %v596_v6 = vmul.f32 %v1729_v50, %v1793_v26 }
  0x41   : > { %v1171_v21 = vmul.f32 0.5, %v1143_v57  ;;  %1516 = vtanh.f32 %v1089_v7  ;;  %v923_v23 = vadd.f32 %v731_v35, %v523_v42  ;;  %v664_v18 = vmul.f32 %v1731_v51, %v1852_v53 }
  0x42   : > { %v1062_v61 = vadd.f32 %v1034_v34, %v1914_v0  ;;  %v524_v27 = vadd.f32 %v494_v55, %v460_v49  ;;  %v628_v33 = vadd.f32 %v596_v6, %v560_v20  ;;  %v768_v36 = vmul.f32 %v1747_v62, %v1928_v12 }
  0x43   : > { %v1199_v46 = vmul.f32 %v1171_v21, %v1810_v58  ;;  %v1961_v43 = vadd.f32 %v923_v23, %v895_v4  ;;  %v802_v42 = vmul.f32 %v1749_v63, %v1879_v9  ;;  %v866_v57 = vmul.f32 %v1737_v56, %v1935_v30 }
  0x44   : > { %v1515_v7 = vpop.eup %1514  ;;  %v1090_v35 = vmul.f32 0.7978846, %v1062_v61  ;;  %v696_v45 = vadd.f32 %v664_v18, %v628_v33  ;;  %v188_v55 = vrot.slane %v1952_v47, 7  ;;  %v204_v34 = vrot.slane %v1955_v24, 7 }
  0x45   : > { %v1231_v49 = vmul.f32 %v1743_v59, %v1199_v46  ;;  %v1144_v20 = vadd.f32 1.0, %v1515_v7  ;;  %v979_v58 = vmul.f32 %v1961_v43, %v1961_v43  ;;  %v832_v4 = vadd.f32 %v802_v42, %v768_v36 }
  0x46   : > { %1518 = vtanh.f32 %v1090_v35  ;;  %v732_v6 = vadd.f32 %v1733_v52, %v696_v45  ;;  %v237_v21 = vsel %vm215_vm1, %v204_v34, %v188_v55  ;;  %v291_v23 = vrot.slane %v1952_v47, 1 }
  0x47   : > { %v1263_v18 = vadd.f32 %v1745_v60, %v1231_v49  ;;  %v1172_v61 = vmul.f32 0.5, %v1144_v20  ;;  %v1007_v33 = vmul.f32 %v979_v58, %v1961_v43  ;;  %v896_v28 = vadd.f32 %v866_v57, %v832_v4 }
  0x48   : > { %v924_v36 = vadd.f32 %v732_v6, %v524_v27  ;;  %v1987_v45 = vsel %vm181_vm0, 0.0, %v237_v21  ;;  %v307_v46 = vrot.slane %v1955_v24, 1  ;;  %v397_v42 = vmul.f32 %v1659_v19, %v1818_v3 }
  0x49   : > { %v1291_v7 = vadd.f32 %v1263_v18, %v1642_v10  ;;  %v1200_v57 = vmul.f32 %v1172_v61, %v1848_v54  ;;  %v1035_v35 = vmul.f32 0.044715, %v1007_v33  ;;  %v431_v49 = vmul.f32 %v1701_v39, %v1790_v25 }
  0x4a   : > { %v1996_v20 = vadd.f32 %v924_v36, %v896_v28  ;;  %v2000_v27 = vsel %vm318_vm2, %v291_v23, %v307_v46  ;;  %v495_v58 = vmul.f32 %v1703_v40, %v1822_v11  ;;  %v561_v3 = vmul.f32 %v1715_v44, %v1905_v29 }
  0x4b   : > { %v1517_v4 = vpop.eup %1516  ;;  %1470 = vst.msk [vmem:[%s1983_s21 + $0x10] sm:$0xff] %vm1320_vm4, %v1291_v7  ;;  %v1232_v10 = vmul.f32 %v1743_v59, %v1200_v57  ;;  %v1063_v54 = vadd.f32 %v1035_v35, %v1961_v43  ;;  %v461_v6 = vadd.f32 %v431_v49, %v397_v42  ;;  %v597_v28 = vmul.f32 %v1729_v50, %v1868_v16 }
  0x4c   : > { %v1145_v21 = vadd.f32 1.0, %v1517_v4  ;;  %v980_v18 = vmul.f32 %v1996_v20, %v1996_v20  ;;  %v665_v11 = vmul.f32 %v1731_v51, %v1899_v22  ;;  %v769_v61 = vmul.f32 %v1747_v62, %v1987_v45 }
  0x4d   : > { %v1264_v33 = vadd.f32 %v1745_v60, %v1232_v10  ;;  %v1091_v36 = vmul.f32 0.7978846, %v1063_v54  ;;  %v525_v7 = vadd.f32 %v495_v58, %v461_v6  ;;  %v629_v57 = vadd.f32 %v597_v28, %v561_v3 }
  0x4e   : > { %v1173_v42 = vmul.f32 0.5, %v1145_v21  ;;  %v1008_v35 = vmul.f32 %v980_v18, %v1996_v20  ;;  %v803_v49 = vmul.f32 %v1749_v63, %v1952_v47  ;;  %v867_v4 = vmul.f32 %v1737_v56, %v2000_v27 }
  0x4f   : > { %v1292_v17 = vadd.f32 %v1264_v33, %v1648_v13  ;;  %1520 = vtanh.f32 %v1091_v36  ;;  %v697_v5 = vadd.f32 %v665_v11, %v629_v57  ;;  %v2027_v10 = vsel %vm215_vm1, %v188_v55, %v204_v34 }
  0x50   : > { %v1519_v54 = vpop.eup %1518  ;;  %v1201_v58 = vmul.f32 %v1173_v42, %v1884_v48  ;;  %v1036_v3 = vmul.f32 0.044715, %v1008_v35  ;;  %v833_v6 = vadd.f32 %v803_v49, %v769_v61  ;;  %v340_v28 = vsel %vm318_vm2, %v307_v46, %v291_v23  ;;  %v2060_v49 = vld [vmem:[%s1626_s14 + $0x60] sm:$0xff] }
  0x51   : > { %1471 = vst.msk [vmem:[%s1983_s21 + $0x18] sm:$0xff] %vm1320_vm4, %v1292_v17  ;;  %v1146_v21 = vadd.f32 1.0, %v1519_v54  ;;  %v733_v18 = vadd.f32 %v1733_v52, %v697_v5  ;;  %v2037_v13 = vsel %vm285_vm3, 0.0, %v340_v28  ;;  %v398_v55 = vmul.f32 %v1659_v19, %v1844_v38 }
  0x52   : > { %v1233_v34 = vmul.f32 %v1743_v59, %v1201_v58  ;;  %v1064_v48 = vadd.f32 %v1036_v3, %v1996_v20  ;;  %v897_v11 = vadd.f32 %v867_v4, %v833_v6  ;;  %v432_v17 = vmul.f32 %v1701_v39, %v1793_v26  ;;  %v2063_v4 = vld [vmem:[%s1626_s14 + $0x68] sm:$0xff] }
  0x53   : > { %v1174_v23 = vmul.f32 0.5, %v1146_v21  ;;  %v925_v46 = vadd.f32 %v733_v18, %v525_v7  ;;  %v496_v5 = vmul.f32 %v1703_v40, %v1852_v53  ;;  %v562_v61 = vmul.f32 %v1715_v44, %v1928_v12 }
  0x54   : > { %v1265_v38 = vadd.f32 %v1745_v60, %v1233_v34  ;;  %v1092_v33 = vmul.f32 0.7978846, %v1064_v48  ;;  %v462_v36 = vadd.f32 %v432_v17, %v398_v55  ;;  %v598_v57 = vmul.f32 %v1729_v50, %v1879_v9 }
  0x55   : > { %v1202_v42 = vmul.f32 %v1174_v23, %v1914_v0  ;;  %v2053_v35 = vadd.f32 %v925_v46, %v897_v11  ;;  %v666_v7 = vmul.f32 %v1731_v51, %v1935_v30  ;;  %v770_v53 = vmul.f32 %v1747_v62, %v2027_v10 }
  0x56   : > { %v1293_v54 = vadd.f32 %v1265_v38, %v1651_v14  ;;  %1522 = vtanh.f32 %v1092_v33  ;;  %v526_v58 = vadd.f32 %v496_v5, %v462_v36  ;;  %v630_v3 = vadd.f32 %v598_v57, %v562_v61 }
  0x57   : > { %v1234_v6 = vmul.f32 %v1743_v59, %v1202_v42  ;;  %v981_v0 = vmul.f32 %v2053_v35, %v2053_v35  ;;  %v804_v28 = vmul.f32 %v1749_v63, %v1955_v24  ;;  %v868_v21 = vmul.f32 %v1737_v56, %v2037_v13 }
  0x58   : > { %1472 = vst.msk [vmem:[%s1983_s21 + $0x20] sm:$0xff] %vm1320_vm4, %v1293_v54  ;;  %v698_v18 = vadd.f32 %v666_v7, %v630_v3  ;;  %v189_v55 = vrot.slane %v2060_v49, 7  ;;  %v205_v14 = vrot.slane %v2063_v4, 7  ;;  %v292_v34 = vrot.slane %v2060_v49, 1 }
  0x59   : > { %v1521_v48 = vpop.eup %1520  ;;  %v1266_v11 = vadd.f32 %v1745_v60, %v1234_v6  ;;  %v1009_v17 = vmul.f32 %v981_v0, %v2053_v35  ;;  %v834_v23 = vadd.f32 %v804_v28, %v770_v53  ;;  %v308_v46 = vrot.slane %v2063_v4, 1 }
  0x5a   : > { %v1147_v5 = vadd.f32 1.0, %v1521_v48  ;;  %v734_v61 = vadd.f32 %v1733_v52, %v698_v18  ;;  %v238_v38 = vsel %vm215_vm1, %v205_v14, %v189_v55  ;;  %v399_v33 = vmul.f32 %v1659_v19, %v1905_v29 }
  0x5b   : > { %v1294_v36 = vadd.f32 %v1266_v11, %v1654_v15  ;;  %v1037_v57 = vmul.f32 0.044715, %v1009_v17  ;;  %v898_v42 = vadd.f32 %v868_v21, %v834_v23  ;;  %v2089_v7 = vsel %vm181_vm0, 0.0, %v238_v38 }
  0x5c   : > { %v1175_v53 = vmul.f32 0.5, %v1147_v5  ;;  %v926_v54 = vadd.f32 %v734_v61, %v526_v58  ;;  %v2093_v3 = vsel %vm318_vm2, %v292_v34, %v308_v46  ;;  %v433_v6 = vmul.f32 %v1701_v39, %v1868_v16 }
  0x5d   : > { %1473 = vst.msk [vmem:[%s1983_s21 + $0x28] sm:$0xff] %vm1320_vm4, %v1294_v36  ;;  %v1065_v29 = vadd.f32 %v1037_v57, %v2053_v35  ;;  %v497_v15 = vmul.f32 %v1703_v40, %v1899_v22  ;;  %v563_v0 = vmul.f32 %v1715_v44, %v1987_v45  ;;  %v599_v58 = vmul.f32 %v1729_v50, %v1952_v47 }
  0x5e   : > { %v1203_v28 = vmul.f32 %v1175_v53, %v1961_v43  ;;  %v2107_v21 = vadd.f32 %v926_v54, %v898_v42  ;;  %v463_v18 = vadd.f32 %v433_v6, %v399_v33  ;;  %v667_v48 = vmul.f32 %v1731_v51, %v2000_v27 }
  0x5f   : > { %v1093_v11 = vmul.f32 0.7978846, %v1065_v29  ;;  %v631_v17 = vadd.f32 %v599_v58, %v563_v0  ;;  %v771_v23 = vmul.f32 %v1747_v62, %v2089_v7  ;;  %v805_v22 = vmul.f32 %v1749_v63, %v2060_v49 }
  0x60   : > { %v1523_v5 = vpop.eup %1522  ;;  %v1235_v61 = vmul.f32 %v1743_v59, %v1203_v28  ;;  %v982_v43 = vmul.f32 %v2107_v21, %v2107_v21  ;;  %v527_v38 = vadd.f32 %v497_v15, %v463_v18  ;;  %v869_v33 = vmul.f32 %v1737_v56, %v2093_v3 }
  0x61   : > { %v1148_v36 = vadd.f32 1.0, %v1523_v5  ;;  %1524 = vtanh.f32 %v1093_v11  ;;  %v699_v57 = vadd.f32 %v667_v48, %v631_v17  ;;  %v835_v42 = vadd.f32 %v805_v22, %v771_v23  ;;  %v2151_v5 = vld [vmem:[%s1626_s14 + $0x70] sm:$0xff] }
  0x62   : > { %v1267_v53 = vadd.f32 %v1745_v60, %v1235_v61  ;;  %v1010_v54 = vmul.f32 %v982_v43, %v2107_v21  ;;  %v2124_v6 = vsel %vm215_vm1, %v189_v55, %v205_v14  ;;  %v341_v29 = vsel %vm318_vm2, %v308_v46, %v292_v34 }
  0x63   : > { %v1176_v15 = vmul.f32 0.5, %v1148_v36  ;;  %v735_v0 = vadd.f32 %v1733_v52, %v699_v57  ;;  %v899_v58 = vadd.f32 %v869_v33, %v835_v42  ;;  %v2131_v28 = vsel %vm285_vm3, 0.0, %v341_v29 }
  0x64   : > { %v1295_v18 = vadd.f32 %v1267_v53, %v1790_v25  ;;  %v1038_v48 = vmul.f32 0.044715, %v1010_v54  ;;  %v400_v11 = vmul.f32 %v1659_v19, %v1928_v12  ;;  %v434_v55 = vmul.f32 %v1701_v39, %v1879_v9 }
  0x65   : > { %v1204_v14 = vmul.f32 %v1176_v15, %v1996_v20  ;;  %v927_v34 = vadd.f32 %v735_v0, %v527_v38  ;;  %v498_v46 = vmul.f32 %v1703_v40, %v1935_v30  ;;  %v564_v17 = vmul.f32 %v1715_v44, %v2027_v10  ;;  %v2161_v38 = vld [vmem:[%s1626_s14 + $0x78] sm:$0xff] }
  0x66   : > { %1474 = vst.msk [vmem:[%s1983_s21 + $0x30] sm:$0xff] %vm1320_vm4, %v1295_v18  ;;  %v1066_v25 = vadd.f32 %v1038_v48, %v2107_v21  ;;  %v464_v23 = vadd.f32 %v434_v55, %v400_v11  ;;  %v600_v12 = vmul.f32 %v1729_v50, %v1955_v24  ;;  %v668_v22 = vmul.f32 %v1731_v51, %v2037_v13 }
  0x67   : > { %v1236_v20 = vmul.f32 %v1743_v59, %v1204_v14  ;;  %v2154_v61 = vadd.f32 %v927_v34, %v899_v58  ;;  %v772_v30 = vmul.f32 %v1747_v62, %v2124_v6  ;;  %v806_v43 = vmul.f32 %v1749_v63, %v2063_v4 }
  0x68   : > { %v1094_v33 = vmul.f32 0.7978846, %v1066_v25  ;;  %v528_v36 = vadd.f32 %v498_v46, %v464_v23  ;;  %v632_v57 = vadd.f32 %v600_v12, %v564_v17  ;;  %v870_v42 = vmul.f32 %v1737_v56, %v2131_v28 }
  0x69   : > { %v1268_v53 = vadd.f32 %v1745_v60, %v1236_v20  ;;  %v983_v54 = vmul.f32 %v2154_v61, %v2154_v61  ;;  %v836_v29 = vadd.f32 %v806_v43, %v772_v30  ;;  %v190_v15 = vrot.slane %v2151_v5, 7 }
  0x6a   : > { %1526 = vtanh.f32 %v1094_v33  ;;  %v700_v0 = vadd.f32 %v668_v22, %v632_v57  ;;  %v206_v58 = vrot.slane %v2161_v38, 7  ;;  %v293_v18 = vrot.slane %v2151_v5, 1 }
  0x6b   : > { %v1525_v48 = vpop.eup %1524  ;;  %v1296_v11 = vadd.f32 %v1268_v53, %v1793_v26  ;;  %v1011_v55 = vmul.f32 %v983_v54, %v2154_v61  ;;  %v900_v14 = vadd.f32 %v870_v42, %v836_v29  ;;  %v309_v34 = vrot.slane %v2161_v38, 1 }
  0x6c   : > { %v1149_v46 = vadd.f32 1.0, %v1525_v48  ;;  %v736_v17 = vadd.f32 %v1733_v52, %v700_v0  ;;  %v239_v25 = vsel %vm215_vm1, %v206_v58, %v190_v15  ;;  %v401_v23 = vmul.f32 %v1659_v19, %v1987_v45 }
  0x6d   : > { %1475 = vst.msk [vmem:[%s1983_s21 + $0x38] sm:$0xff] %vm1320_vm4, %v1296_v11  ;;  %v1039_v12 = vmul.f32 0.044715, %v1011_v55  ;;  %v2183_v26 = vsel %vm181_vm0, 0.0, %v239_v25  ;;  %v2187_v22 = vsel %vm318_vm2, %v293_v18, %v309_v34  ;;  %v435_v20 = vmul.f32 %v1701_v39, %v1952_v47 }
  0x6e   : > { %v1177_v30 = vmul.f32 0.5, %v1149_v46  ;;  %v928_v43 = vadd.f32 %v736_v17, %v528_v36  ;;  %v499_v33 = vmul.f32 %v1703_v40, %v2000_v27  ;;  %v565_v45 = vmul.f32 %v1715_v44, %v2089_v7 }
  0x6f   : > { %v1067_v57 = vadd.f32 %v1039_v12, %v2154_v61  ;;  %v465_v42 = vadd.f32 %v435_v20, %v401_v23  ;;  %v601_v53 = vmul.f32 %v1729_v50, %v2060_v49  ;;  %v669_v54 = vmul.f32 %v1731_v51, %v2093_v3 }
  0x70   : > { %v1205_v29 = vmul.f32 %v1177_v30, %v2053_v35  ;;  %v2201_v0 = vadd.f32 %v928_v43, %v900_v14  ;;  %v773_v36 = vmul.f32 %v1747_v62, %v2183_v26  ;;  %v807_v27 = vmul.f32 %v1749_v63, %v2151_v5 }
  0x71   : > { %v1095_v48 = vmul.f32 0.7978846, %v1067_v57  ;;  %v529_v11 = vadd.f32 %v499_v33, %v465_v42  ;;  %v633_v55 = vadd.f32 %v601_v53, %v565_v45  ;;  %v871_v46 = vmul.f32 %v1737_v56, %v2187_v22 }
  0x72   : > { %v1237_v17 = vmul.f32 %v1743_v59, %v1205_v29  ;;  %v984_v25 = vmul.f32 %v2201_v0, %v2201_v0  ;;  %v837_v35 = vadd.f32 %v807_v27, %v773_v36  ;;  %v2214_v14 = vsel %vm215_vm1, %v190_v15, %v206_v58 }
  0x73   : > { %1528 = vtanh.f32 %v1095_v48  ;;  %v701_v23 = vadd.f32 %v669_v54, %v633_v55  ;;  %v342_v12 = vsel %vm318_vm2, %v309_v34, %v293_v18  ;;  %v402_v20 = vmul.f32 %v1659_v19, %v2027_v10  ;;  %v2239_v55 = vld [vmem:[%s1626_s14 + $0x80] sm:$0xff] }
  0x74   : > { %v1527_v30 = vpop.eup %1526  ;;  %v1269_v43 = vadd.f32 %v1745_v60, %v1237_v17  ;;  %v1012_v33 = vmul.f32 %v984_v25, %v2201_v0  ;;  %v901_v45 = vadd.f32 %v871_v46, %v837_v35  ;;  %v2224_v15 = vsel %vm285_vm3, 0.0, %v342_v12  ;;  %v2249_v25 = vld [vmem:[%s1626_s14 + $0x88] sm:$0xff] }
  0x75   : > { %v1150_v58 = vadd.f32 1.0, %v1527_v30  ;;  %v737_v57 = vadd.f32 %v1733_v52, %v701_v23  ;;  %v436_v18 = vmul.f32 %v1701_v39, %v1955_v24  ;;  %v500_v10 = vmul.f32 %v1703_v40, %v2037_v13 }
  0x76   : > { %v1297_v34 = vadd.f32 %v1269_v43, %v1868_v16  ;;  %v1040_v42 = vmul.f32 0.044715, %v1012_v33  ;;  %v566_v53 = vmul.f32 %v1715_v44, %v2124_v6  ;;  %v602_v54 = vmul.f32 %v1729_v50, %v2063_v4 }
  0x77   : > { %v1178_v29 = vmul.f32 0.5, %v1150_v58  ;;  %v929_v36 = vadd.f32 %v737_v57, %v529_v11  ;;  %v466_v27 = vadd.f32 %v436_v18, %v402_v20  ;;  %v670_v48 = vmul.f32 %v1731_v51, %v2131_v28 }
  0x78   : > { %1476 = vst.msk [vmem:[%s1983_s21 + $0x40] sm:$0xff] %vm1320_vm4, %v1297_v34  ;;  %v1068_v13 = vadd.f32 %v1040_v42, %v2201_v0  ;;  %v634_v16 = vadd.f32 %v602_v54, %v566_v53  ;;  %v774_v46 = vmul.f32 %v1747_v62, %v2214_v14  ;;  %v808_v17 = vmul.f32 %v1749_v63, %v2161_v38 }
  0x79   : > { %v1206_v11 = vmul.f32 %v1178_v29, %v2107_v21  ;;  %v2252_v35 = vadd.f32 %v929_v36, %v901_v45  ;;  %v530_v23 = vadd.f32 %v500_v10, %v466_v27  ;;  %v872_v12 = vmul.f32 %v1737_v56, %v2224_v15 }
  0x7a   : > { %v1096_v20 = vmul.f32 0.7978846, %v1068_v13  ;;  %v702_v30 = vadd.f32 %v670_v48, %v634_v16  ;;  %v838_v43 = vadd.f32 %v808_v17, %v774_v46  ;;  %v191_v33 = vrot.slane %v2239_v55, 7 }
  0x7b   : > { %v1238_v58 = vmul.f32 %v1743_v59, %v1206_v11  ;;  %v985_v57 = vmul.f32 %v2252_v35, %v2252_v35  ;;  %v207_v18 = vrot.slane %v2249_v25, 7  ;;  %v294_v21 = vrot.slane %v2239_v55, 1 }
  0x7c   : > { %1530 = vtanh.f32 %v1096_v20  ;;  %v738_v45 = vadd.f32 %v1733_v52, %v702_v30  ;;  %v902_v10 = vadd.f32 %v872_v12, %v838_v43  ;;  %v310_v34 = vrot.slane %v2249_v25, 1 }
  0x7d   : > { %v1529_v42 = vpop.eup %1528  ;;  %v1270_v53 = vadd.f32 %v1745_v60, %v1238_v58  ;;  %v1013_v54 = vmul.f32 %v985_v57, %v2252_v35  ;;  %v240_v29 = vsel %vm215_vm1, %v207_v18, %v191_v33  ;;  %v403_v36 = vmul.f32 %v1659_v19, %v2089_v7 }
  0x7e   : > { %v1151_v27 = vadd.f32 1.0, %v1529_v42  ;;  %v930_v48 = vadd.f32 %v738_v45, %v530_v23  ;;  %v2272_v13 = vsel %vm181_vm0, 0.0, %v240_v29  ;;  %v2276_v16 = vsel %vm318_vm2, %v294_v21, %v310_v34 }
  0x7f   : > { %v1298_v46 = vadd.f32 %v1270_v53, %v1879_v9  ;;  %v1041_v17 = vmul.f32 0.044715, %v1013_v54  ;;  %v437_v11 = vmul.f32 %v1701_v39, %v2060_v49  ;;  %v501_v12 = vmul.f32 %v1703_v40, %v2093_v3 }
  0x80   : > { %v1179_v7 = vmul.f32 0.5, %v1151_v27  ;;  %v2283_v20 = vadd.f32 %v930_v48, %v902_v10  ;;  %v567_v23 = vmul.f32 %v1715_v44, %v2183_v26  ;;  %v603_v30 = vmul.f32 %v1729_v50, %v2151_v5 }
  0x81   : > { %1477 = vst.msk [vmem:[%s1983_s21 + $0x48] sm:$0xff] %vm1320_vm4, %v1298_v46  ;;  %v1069_v9 = vadd.f32 %v1041_v17, %v2252_v35  ;;  %v467_v43 = vadd.f32 %v437_v11, %v403_v36  ;;  %v671_v58 = vmul.f32 %v1731_v51, %v2187_v22  ;;  %v775_v3 = vmul.f32 %v1747_v62, %v2272_v13 }
  0x82   : > { %v1207_v57 = vmul.f32 %v1179_v7, %v2154_v61  ;;  %v986_v45 = vmul.f32 %v2283_v20, %v2283_v20  ;;  %v635_v10 = vadd.f32 %v603_v30, %v567_v23  ;;  %v809_v42 = vmul.f32 %v1749_v63, %v2239_v55 }
  0x83   : > { %v1097_v53 = vmul.f32 0.7978846, %v1069_v9  ;;  %v531_v54 = vadd.f32 %v501_v12, %v467_v43  ;;  %v873_v29 = vmul.f32 %v1737_v56, %v2276_v16  ;;  %v2305_v36 = vsel %vm215_vm1, %v191_v33, %v207_v18 }
  0x84   : > { %v1239_v27 = vmul.f32 %v1743_v59, %v1207_v57  ;;  %v1014_v61 = vmul.f32 %v986_v45, %v2283_v20  ;;  %v703_v48 = vadd.f32 %v671_v58, %v635_v10  ;;  %v839_v46 = vadd.f32 %v809_v42, %v775_v3  ;;  %v2328_v45 = vld [vmem:[%s1626_s14 + $0x90] sm:$0xff] }
  0x85   : > { %1532 = vtanh.f32 %v1097_v53  ;;  %v343_v17 = vsel %vm318_vm2, %v310_v34, %v294_v21  ;;  %v404_v11 = vmul.f32 %v1659_v19, %v2124_v6  ;;  %v438_v12 = vmul.f32 %v1701_v39, %v2063_v4 }
  0x86   : > { %v1531_v7 = vpop.eup %1530  ;;  %v1271_v33 = vadd.f32 %v1745_v60, %v1239_v27  ;;  %v1042_v18 = vmul.f32 0.044715, %v1014_v61  ;;  %v739_v23 = vadd.f32 %v1733_v52, %v703_v48  ;;  %v903_v30 = vadd.f32 %v873_v29, %v839_v46  ;;  %v2335_v27 = vld [vmem:[%s1626_s14 + $0x98] sm:$0xff] }
  0x87   : > { %v1152_v9 = vadd.f32 1.0, %v1531_v7  ;;  %v2319_v21 = vsel %vm285_vm3, 0.0, %v343_v17  ;;  %v468_v34 = vadd.f32 %v438_v12, %v404_v11  ;;  %v502_v6 = vmul.f32 %v1703_v40, %v2131_v28 }
  0x88   : > { %v1299_v43 = vadd.f32 %v1271_v33, %v1952_v47  ;;  %v1070_v58 = vadd.f32 %v1042_v18, %v2283_v20  ;;  %v931_v3 = vadd.f32 %v739_v23, %v531_v54  ;;  %v568_v57 = vmul.f32 %v1715_v44, %v2214_v14 }
  0x89   : > { %v1180_v10 = vmul.f32 0.5, %v1152_v9  ;;  %v532_v42 = vadd.f32 %v502_v6, %v468_v34  ;;  %v604_v53 = vmul.f32 %v1729_v50, %v2161_v38  ;;  %v672_v29 = vmul.f32 %v1731_v51, %v2224_v15 }
  0x8a   : > { %1478 = vst.msk [vmem:[%s1983_s21 + $0x50] sm:$0xff] %vm1320_vm4, %v1299_v43  ;;  %v1098_v47 = vmul.f32 0.7978846, %v1070_v58  ;;  %v2339_v28 = vadd.f32 %v931_v3, %v903_v30  ;;  %v776_v54 = vmul.f32 %v1747_v62, %v2305_v36  ;;  %v810_v61 = vmul.f32 %v1749_v63, %v2249_v25 }
  0x8b   : > { %v1208_v48 = vmul.f32 %v1180_v10, %v2201_v0  ;;  %v636_v46 = vadd.f32 %v604_v53, %v568_v57  ;;  %v874_v17 = vmul.f32 %v1737_v56, %v2319_v21  ;;  %v192_v11 = vrot.slane %v2328_v45, 7 }
  0x8c   : > { %1534 = vtanh.f32 %v1098_v47  ;;  %v987_v12 = vmul.f32 %v2339_v28, %v2339_v28  ;;  %v840_v7 = vadd.f32 %v810_v61, %v776_v54  ;;  %v208_v33 = vrot.slane %v2335_v27, 7 }
  0x8d   : > { %v1240_v18 = vmul.f32 %v1743_v59, %v1208_v48  ;;  %v704_v23 = vadd.f32 %v672_v29, %v636_v46  ;;  %v295_v30 = vrot.slane %v2328_v45, 1  ;;  %v311_v0 = vrot.slane %v2335_v27, 1 }
  0x8e   : > { %v1015_v9 = vmul.f32 %v987_v12, %v2339_v28  ;;  %v904_v34 = vadd.f32 %v874_v17, %v840_v7  ;;  %v241_v6 = vsel %vm215_vm1, %v208_v33, %v192_v11  ;;  %v405_v43 = vmul.f32 %v1659_v19, %v2183_v26 }
  0x8f   : > { %v1533_v58 = vpop.eup %1532  ;;  %v1272_v3 = vadd.f32 %v1745_v60, %v1240_v18  ;;  %v740_v57 = vadd.f32 %v1733_v52, %v704_v23  ;;  %v2364_v10 = vsel %vm181_vm0, 0.0, %v241_v6  ;;  %v2368_v53 = vsel %vm318_vm2, %v295_v30, %v311_v0 }
  0x90   : > { %v1153_v29 = vadd.f32 1.0, %v1533_v58  ;;  %v1043_v47 = vmul.f32 0.044715, %v1015_v9  ;;  %v439_v54 = vmul.f32 %v1701_v39, %v2151_v5  ;;  %v503_v26 = vmul.f32 %v1703_v40, %v2187_v22 }
  0x91   : > { %v1300_v61 = vadd.f32 %v1272_v3, %v1955_v24  ;;  %v932_v48 = vadd.f32 %v740_v57, %v532_v42  ;;  %v569_v46 = vmul.f32 %v1715_v44, %v2272_v13  ;;  %v605_v17 = vmul.f32 %v1729_v50, %v2239_v55 }
  0x92   : > { %v1181_v12 = vmul.f32 0.5, %v1153_v29  ;;  %v1071_v7 = vadd.f32 %v1043_v47, %v2339_v28  ;;  %v469_v18 = vadd.f32 %v439_v54, %v405_v43  ;;  %v673_v23 = vmul.f32 %v1731_v51, %v2276_v16 }
  0x93   : > { %1479 = vst.msk [vmem:[%s1983_s21 + $0x58] sm:$0xff] %vm1320_vm4, %v1300_v61  ;;  %v2384_v9 = vadd.f32 %v932_v48, %v904_v34  ;;  %v637_v22 = vadd.f32 %v605_v17, %v569_v46  ;;  %v777_v24 = vmul.f32 %v1747_v62, %v2364_v10  ;;  %v811_v42 = vmul.f32 %v1749_v63, %v2328_v45 }
  0x94   : > { %v1209_v6 = vmul.f32 %v1181_v12, %v2252_v35  ;;  %v1099_v58 = vmul.f32 0.7978846, %v1071_v7  ;;  %v533_v3 = vadd.f32 %v503_v26, %v469_v18  ;;  %v875_v43 = vmul.f32 %v1737_v56, %v2368_v53 }
  0x95   : > { %v988_v57 = vmul.f32 %v2384_v9, %v2384_v9  ;;  %v705_v29 = vadd.f32 %v673_v23, %v637_v22  ;;  %v841_v34 = vadd.f32 %v811_v42, %v777_v24  ;;  %v2397_v47 = vsel %vm215_vm1, %v192_v11, %v208_v33 }
  0x96   : > { %v1535_v54 = vpop.eup %1534  ;;  %v1241_v61 = vmul.f32 %v1743_v59, %v1209_v6  ;;  %1536 = vtanh.f32 %v1099_v58  ;;  %v344_v35 = vsel %vm318_vm2, %v311_v0, %v295_v30  ;;  %v406_v26 = vmul.f32 %v1659_v19, %v2214_v14  ;;  %v2423_v58 = vld [vmem:[%s1626_s14 + $0xa0] sm:$0xff] }
  0x97   : > { %v1154_v48 = vadd.f32 1.0, %v1535_v54  ;;  %v1016_v46 = vmul.f32 %v988_v57, %v2384_v9  ;;  %v741_v17 = vadd.f32 %v1733_v52, %v705_v29  ;;  %v905_v12 = vadd.f32 %v875_v43, %v841_v34  ;;  %v2432_v29 = vld [vmem:[%s1626_s14 + $0xa8] sm:$0xff] }
  0x98   : > { %v1273_v11 = vadd.f32 %v1745_v60, %v1241_v61  ;;  %v2409_v33 = vsel %vm285_vm3, 0.0, %v344_v35  ;;  %v440_v30 = vmul.f32 %v1701_v39, %v2161_v38  ;;  %v504_v14 = vmul.f32 %v1703_v40, %v2224_v15 }
  0x99   : > { %v1182_v0 = vmul.f32 0.5, %v1154_v48  ;;  %v1044_v7 = vmul.f32 0.044715, %v1016_v46  ;;  %v933_v18 = vadd.f32 %v741_v17, %v533_v3  ;;  %v570_v23 = vmul.f32 %v1715_v44, %v2305_v36 }
  0x9a   : > { %v1301_v22 = vadd.f32 %v1273_v11, %v2060_v49  ;;  %v470_v24 = vadd.f32 %v440_v30, %v406_v26  ;;  %v606_v42 = vmul.f32 %v1729_v50, %v2249_v25  ;;  %v674_v6 = vmul.f32 %v1731_v51, %v2319_v21 }
  0x9b   : > { %v1210_v43 = vmul.f32 %v1182_v0, %v2283_v20  ;;  %v1072_v15 = vadd.f32 %v1044_v7, %v2384_v9  ;;  %v2427_v57 = vadd.f32 %v933_v18, %v905_v12  ;;  %v778_v3 = vmul.f32 %v1747_v62, %v2397_v47 }
  0x9c   : > { %1480 = vst.msk [vmem:[%s1983_s21 + $0x60] sm:$0xff] %vm1320_vm4, %v1301_v22  ;;  %v534_v49 = vadd.f32 %v504_v14, %v470_v24  ;;  %v638_v34 = vadd.f32 %v606_v42, %v570_v23  ;;  %v812_v54 = vmul.f32 %v1749_v63, %v2335_v27  ;;  %v876_v61 = vmul.f32 %v1737_v56, %v2409_v33 }
  0x9d   : > { %v1242_v20 = vmul.f32 %v1743_v59, %v1210_v43  ;;  %v1100_v35 = vmul.f32 0.7978846, %v1072_v15  ;;  %v989_v26 = vmul.f32 %v2427_v57, %v2427_v57  ;;  %v193_v48 = vrot.slane %v2423_v58, 7 }
  0x9e   : > { %v706_v46 = vadd.f32 %v674_v6, %v638_v34  ;;  %v842_v17 = vadd.f32 %v812_v54, %v778_v3  ;;  %v209_v12 = vrot.slane %v2432_v29, 7  ;;  %v296_v11 = vrot.slane %v2423_v58, 1 }
  0x9f   : > { %v1274_v30 = vadd.f32 %v1745_v60, %v1242_v20  ;;  %1538 = vtanh.f32 %v1100_v35  ;;  %v1017_v14 = vmul.f32 %v989_v26, %v2427_v57  ;;  %v312_v0 = vrot.slane %v2432_v29, 1 }
  0xa0   : > { %v1537_v7 = vpop.eup %1536  ;;  %v742_v18 = vadd.f32 %v1733_v52, %v706_v46  ;;  %v906_v23 = vadd.f32 %v876_v61, %v842_v17  ;;  %v242_v22 = vsel %vm215_vm1, %v209_v12, %v193_v48  ;;  %v407_v24 = vmul.f32 %v1659_v19, %v2272_v13 }
  0xa1   : > { %v1302_v42 = vadd.f32 %v1274_v30, %v2063_v4  ;;  %v1155_v6 = vadd.f32 1.0, %v1537_v7  ;;  %v1045_v43 = vmul.f32 0.044715, %v1017_v14  ;;  %v2457_v15 = vsel %vm181_vm0, 0.0, %v242_v22 }
  0xa2   : > { %v934_v3 = vadd.f32 %v742_v18, %v534_v49  ;;  %v2461_v34 = vsel %vm318_vm2, %v296_v11, %v312_v0  ;;  %v441_v54 = vmul.f32 %v1701_v39, %v2239_v55  ;;  %v505_v61 = vmul.f32 %v1703_v40, %v2276_v16 }
  0xa3   : > { %1481 = vst.msk [vmem:[%s1983_s21 + $0x68] sm:$0xff] %vm1320_vm4, %v1302_v42  ;;  %v1183_v4 = vmul.f32 0.5, %v1155_v6  ;;  %v1073_v13 = vadd.f32 %v1045_v43, %v2427_v57  ;;  %v571_v20 = vmul.f32 %v1715_v44, %v2364_v10  ;;  %v607_v49 = vmul.f32 %v1729_v50, %v2328_v45 }
  0xa4   : > { %v2474_v35 = vadd.f32 %v934_v3, %v906_v23  ;;  %v471_v26 = vadd.f32 %v441_v54, %v407_v24  ;;  %v675_v46 = vmul.f32 %v1731_v51, %v2368_v53  ;;  %v779_v16 = vmul.f32 %v1747_v62, %v2457_v15 }
  0xa5   : > { %v1211_v17 = vmul.f32 %v1183_v4, %v2339_v28  ;;  %v1101_v30 = vmul.f32 0.7978846, %v1073_v13  ;;  %v639_v14 = vadd.f32 %v607_v49, %v571_v20  ;;  %v813_v7 = vmul.f32 %v1749_v63, %v2423_v58 }
  0xa6   : > { %v990_v18 = vmul.f32 %v2474_v35, %v2474_v35  ;;  %v535_v22 = vadd.f32 %v505_v61, %v471_v26  ;;  %v877_v23 = vmul.f32 %v1737_v56, %v2461_v34  ;;  %v2489_v24 = vsel %vm215_vm1, %v193_v48, %v209_v12 }
  0xa7   : > { %v1243_v42 = vmul.f32 %v1743_v59, %v1211_v17  ;;  %1540 = vtanh.f32 %v1101_v30  ;;  %v707_v28 = vadd.f32 %v675_v46, %v639_v14  ;;  %v843_v6 = vadd.f32 %v813_v7, %v779_v16  ;;  %v2513_v30 = vld [vmem:[%s1626_s14 + $0xb0] sm:$0xff] }
  0xa8   : > { %v1018_v43 = vmul.f32 %v990_v18, %v2474_v35  ;;  %v345_v3 = vsel %vm318_vm2, %v312_v0, %v296_v11  ;;  %v408_v54 = vmul.f32 %v1659_v19, %v2305_v36  ;;  %v442_v61 = vmul.f32 %v1701_v39, %v2249_v25 }
  0xa9   : > { %v1539_v4 = vpop.eup %1538  ;;  %v1275_v48 = vadd.f32 %v1745_v60, %v1243_v42  ;;  %v743_v12 = vadd.f32 %v1733_v52, %v707_v28  ;;  %v907_v13 = vadd.f32 %v877_v23, %v843_v6  ;;  %v2503_v20 = vsel %vm285_vm3, 0.0, %v345_v3  ;;  %v2519_v42 = vld [vmem:[%s1626_s14 + $0xb8] sm:$0xff] }
  0xaa   : > { %v1156_v11 = vadd.f32 1.0, %v1539_v4  ;;  %v1046_v0 = vmul.f32 0.044715, %v1018_v43  ;;  %v472_v49 = vadd.f32 %v442_v61, %v408_v54  ;;  %v506_v36 = vmul.f32 %v1703_v40, %v2319_v21 }
  0xab   : > { %v1303_v26 = vadd.f32 %v1275_v48, %v2151_v5  ;;  %v935_v46 = vadd.f32 %v743_v12, %v535_v22  ;;  %v572_v16 = vmul.f32 %v1715_v44, %v2397_v47  ;;  %v608_v17 = vmul.f32 %v1729_v50, %v2335_v27 }
  0xac   : > { %v1184_v14 = vmul.f32 0.5, %v1156_v11  ;;  %v1074_v7 = vadd.f32 %v1046_v0, %v2474_v35  ;;  %v536_v18 = vadd.f32 %v506_v36, %v472_v49  ;;  %v676_v23 = vmul.f32 %v1731_v51, %v2409_v33 }
  0xad   : > { %1482 = vst.msk [vmem:[%s1983_s21 + $0x70] sm:$0xff] %vm1320_vm4, %v1303_v26  ;;  %v2523_v5 = vadd.f32 %v935_v46, %v907_v13  ;;  %v640_v21 = vadd.f32 %v608_v17, %v572_v16  ;;  %v780_v22 = vmul.f32 %v1747_v62, %v2489_v24  ;;  %v814_v28 = vmul.f32 %v1749_v63, %v2432_v29 }
  0xae   : > { %v1212_v6 = vmul.f32 %v1184_v14, %v2384_v9  ;;  %v1102_v43 = vmul.f32 0.7978846, %v1074_v7  ;;  %v878_v3 = vmul.f32 %v1737_v56, %v2503_v20  ;;  %v194_v54 = vrot.slane %v2513_v30, 7 }
  0xaf   : > { %v991_v61 = vmul.f32 %v2523_v5, %v2523_v5  ;;  %v708_v4 = vadd.f32 %v676_v23, %v640_v21  ;;  %v844_v48 = vadd.f32 %v814_v28, %v780_v22  ;;  %v210_v12 = vrot.slane %v2519_v42, 7 }
  0xb0   : > { %v1244_v13 = vmul.f32 %v1743_v59, %v1212_v6  ;;  %1542 = vtanh.f32 %v1102_v43  ;;  %v297_v11 = vrot.slane %v2513_v30, 1  ;;  %v313_v9 = vrot.slane %v2519_v42, 1 }
  0xb1   : > { %v1541_v0 = vpop.eup %1540  ;;  %v1019_v49 = vmul.f32 %v991_v61, %v2523_v5  ;;  %v744_v36 = vadd.f32 %v1733_v52, %v708_v4  ;;  %v908_v26 = vadd.f32 %v878_v3, %v844_v48  ;;  %v243_v46 = vsel %vm215_vm1, %v210_v12, %v194_v54 }
  0xb2   : > { %v1276_v16 = vadd.f32 %v1745_v60, %v1244_v13  ;;  %v1157_v17 = vadd.f32 1.0, %v1541_v0  ;;  %v2546_v14 = vsel %vm181_vm0, 0.0, %v243_v46  ;;  %v2550_v7 = vsel %vm318_vm2, %v297_v11, %v313_v9 }
  0xb3   : > { %v1047_v23 = vmul.f32 0.044715, %v1019_v49  ;;  %v936_v21 = vadd.f32 %v744_v36, %v536_v18  ;;  %v409_v22 = vmul.f32 %v1659_v19, %v2364_v10  ;;  %v443_v28 = vmul.f32 %v1701_v39, %v2328_v45 }
  0xb4   : > { %v1304_v6 = vadd.f32 %v1276_v16, %v2161_v38  ;;  %v1185_v43 = vmul.f32 0.5, %v1157_v17  ;;  %v507_v3 = vmul.f32 %v1703_v40, %v2368_v53  ;;  %v573_v61 = vmul.f32 %v1715_v44, %v2457_v15 }
  0xb5   : > { %v1075_v4 = vadd.f32 %v1047_v23, %v2523_v5  ;;  %v2562_v48 = vadd.f32 %v936_v21, %v908_v26  ;;  %v473_v18 = vadd.f32 %v443_v28, %v409_v22  ;;  %v609_v10 = vmul.f32 %v1729_v50, %v2423_v58 }
  0xb6   : > { %1483 = vst.msk [vmem:[%s1983_s21 + $0x78] sm:$0xff] %vm1320_vm4, %v1304_v6  ;;  %v1213_v13 = vmul.f32 %v1185_v43, %v2427_v57  ;;  %v677_v38 = vmul.f32 %v1731_v51, %v2461_v34  ;;  %v781_v53 = vmul.f32 %v1747_v62, %v2546_v14  ;;  %v815_v0 = vmul.f32 %v1749_v63, %v2513_v30 }
  0xb7   : > { %v1103_v49 = vmul.f32 0.7978846, %v1075_v4  ;;  %v992_v36 = vmul.f32 %v2562_v48, %v2562_v48  ;;  %v537_v26 = vadd.f32 %v507_v3, %v473_v18  ;;  %v641_v46 = vadd.f32 %v609_v10, %v573_v61 }
  0xb8   : > { %v1245_v16 = vmul.f32 %v1743_v59, %v1213_v13  ;;  %v845_v17 = vadd.f32 %v815_v0, %v781_v53  ;;  %v879_v57 = vmul.f32 %v1737_v56, %v2550_v7  ;;  %v2582_v23 = vsel %vm215_vm1, %v194_v54, %v210_v12 }
  0xb9   : > { %1544 = vtanh.f32 %v1103_v49  ;;  %v1020_v21 = vmul.f32 %v992_v36, %v2562_v48  ;;  %v709_v22 = vadd.f32 %v677_v38, %v641_v46  ;;  %v346_v28 = vsel %vm318_vm2, %v313_v9, %v297_v11  ;;  %v2606_v36 = vld [vmem:[%s1626_s14 + $0xc0] sm:$0xff] }
  0xba   : > { %v1543_v6 = vpop.eup %1542  ;;  %v1277_v43 = vadd.f32 %v1745_v60, %v1245_v16  ;;  %v909_v3 = vadd.f32 %v879_v57, %v845_v17  ;;  %v2590_v61 = vsel %vm285_vm3, 0.0, %v346_v28  ;;  %v410_v54 = vmul.f32 %v1659_v19, %v2397_v47  ;;  %v2617_v17 = vld [vmem:[%s1626_s14 + $0xc8] sm:$0xff] }
  0xbb   : > { %v1158_v12 = vadd.f32 1.0, %v1543_v6  ;;  %v1048_v4 = vmul.f32 0.044715, %v1020_v21  ;;  %v745_v18 = vadd.f32 %v1733_v52, %v709_v22  ;;  %v444_v11 = vmul.f32 %v1701_v39, %v2335_v27 }
  0xbc   : > { %v1305_v9 = vadd.f32 %v1277_v43, %v2239_v55  ;;  %v508_v10 = vmul.f32 %v1703_v40, %v2409_v33  ;;  %v574_v13 = vmul.f32 %v1715_v44, %v2489_v24  ;;  %v610_v38 = vmul.f32 %v1729_v50, %v2432_v29 }
  0xbd   : > { %v1186_v47 = vmul.f32 0.5, %v1158_v12  ;;  %v1076_v53 = vadd.f32 %v1048_v4, %v2562_v48  ;;  %v937_v0 = vadd.f32 %v745_v18, %v537_v26  ;;  %v474_v49 = vadd.f32 %v444_v11, %v410_v54 }
  0xbe   : > { %1484 = vst.msk [vmem:[%s1983_s21 + $0x80] sm:$0xff] %vm1320_vm4, %v1305_v9  ;;  %v642_v46 = vadd.f32 %v610_v38, %v574_v13  ;;  %v678_v55 = vmul.f32 %v1731_v51, %v2503_v20  ;;  %v782_v33 = vmul.f32 %v1747_v62, %v2582_v23  ;;  %v816_v16 = vmul.f32 %v1749_v63, %v2519_v42 }
  0xbf   : > { %v1214_v57 = vmul.f32 %v1186_v47, %v2474_v35  ;;  %v1104_v26 = vmul.f32 0.7978846, %v1076_v53  ;;  %v2620_v21 = vadd.f32 %v937_v0, %v909_v3  ;;  %v538_v22 = vadd.f32 %v508_v10, %v474_v49 }
  0xc0   : > { %v710_v28 = vadd.f32 %v678_v55, %v642_v46  ;;  %v846_v6 = vadd.f32 %v816_v16, %v782_v33  ;;  %v880_v43 = vmul.f32 %v1737_v56, %v2590_v61  ;;  %v195_v54 = vrot.slane %v2606_v36, 7 }
  0xc1   : > { %v1246_v12 = vmul.f32 %v1743_v59, %v1214_v57  ;;  %1546 = vtanh.f32 %v1104_v26  ;;  %v993_v4 = vmul.f32 %v2620_v21, %v2620_v21  ;;  %v211_v18 = vrot.slane %v2617_v17, 7 }
  0xc2   : > { %v746_v35 = vadd.f32 %v1733_v52, %v710_v28  ;;  %v910_v3 = vadd.f32 %v880_v43, %v846_v6  ;;  %v298_v11 = vrot.slane %v2606_v36, 1  ;;  %v314_v9 = vrot.slane %v2617_v17, 1 }
  0xc3   : > { %v1545_v10 = vpop.eup %1544  ;;  %v1278_v13 = vadd.f32 %v1745_v60, %v1246_v12  ;;  %v1021_v38 = vmul.f32 %v993_v4, %v2620_v21  ;;  %v244_v47 = vsel %vm215_vm1, %v211_v18, %v195_v54  ;;  %v411_v53 = vmul.f32 %v1659_v19, %v2457_v15 }
  0xc4   : > { %v1159_v0 = vadd.f32 1.0, %v1545_v10  ;;  %v938_v49 = vadd.f32 %v746_v35, %v538_v22  ;;  %v2640_v46 = vsel %vm181_vm0, 0.0, %v244_v47  ;;  %v2644_v55 = vsel %vm318_vm2, %v298_v11, %v314_v9 }
  0xc5   : > { %v1306_v33 = vadd.f32 %v1278_v13, %v2249_v25  ;;  %v1049_v16 = vmul.f32 0.044715, %v1021_v38  ;;  %v445_v57 = vmul.f32 %v1701_v39, %v2423_v58  ;;  %v509_v26 = vmul.f32 %v1703_v40, %v2461_v34 }
  0xc6   : > { %v1187_v15 = vmul.f32 0.5, %v1159_v0  ;;  %v2651_v28 = vadd.f32 %v938_v49, %v910_v3  ;;  %v575_v22 = vmul.f32 %v1715_v44, %v2546_v14  ;;  %v611_v6 = vmul.f32 %v1729_v50, %v2513_v30 }
  0xc7   : > { %1485 = vst.msk [vmem:[%s1983_s21 + $0x88] sm:$0xff] %vm1320_vm4, %v1306_v33  ;;  %v1077_v25 = vadd.f32 %v1049_v16, %v2620_v21  ;;  %v475_v43 = vadd.f32 %v445_v57, %v411_v53  ;;  %v679_v12 = vmul.f32 %v1731_v51, %v2550_v7  ;;  %v783_v34 = vmul.f32 %v1747_v62, %v2640_v46 }
  0xc8   : > { %v1215_v4 = vmul.f32 %v1187_v15, %v2523_v5  ;;  %v994_v35 = vmul.f32 %v2651_v28, %v2651_v28  ;;  %v643_v3 = vadd.f32 %v611_v6, %v575_v22  ;;  %v817_v10 = vmul.f32 %v1749_v63, %v2606_v36 }
  0xc9   : > { %v1105_v13 = vmul.f32 0.7978846, %v1077_v25  ;;  %v539_v38 = vadd.f32 %v509_v26, %v475_v43  ;;  %v881_v47 = vmul.f32 %v1737_v56, %v2644_v55  ;;  %v2673_v53 = vsel %vm215_vm1, %v195_v54, %v211_v18 }
  0xca   : > { %v1247_v0 = vmul.f32 %v1743_v59, %v1215_v4  ;;  %v1022_v5 = vmul.f32 %v994_v35, %v2651_v28  ;;  %v711_v49 = vadd.f32 %v679_v12, %v643_v3  ;;  %v847_v33 = vadd.f32 %v817_v10, %v783_v34  ;;  %v2694_v35 = vld [vmem:[%s1626_s14 + $0xd0] sm:$0xff] }
  0xcb   : > { %v1547_v16 = vpop.eup %1546  ;;  %1548 = vtanh.f32 %v1105_v13  ;;  %v347_v57 = vsel %vm318_vm2, %v314_v9, %v298_v11  ;;  %v412_v26 = vmul.f32 %v1659_v19, %v2489_v24  ;;  %v446_v15 = vmul.f32 %v1701_v39, %v2432_v29 }
  0xcc   : > { %v1279_v54 = vadd.f32 %v1745_v60, %v1247_v0  ;;  %v1160_v18 = vadd.f32 1.0, %v1547_v16  ;;  %v1050_v22 = vmul.f32 0.044715, %v1022_v5  ;;  %v747_v6 = vadd.f32 %v1733_v52, %v711_v49  ;;  %v2703_v0 = vld [vmem:[%s1626_s14 + $0xd8] sm:$0xff] }
  0xcd   : > { %v911_v25 = vadd.f32 %v881_v47, %v847_v33  ;;  %v2687_v43 = vsel %vm285_vm3, 0.0, %v347_v57  ;;  %v476_v11 = vadd.f32 %v446_v15, %v412_v26  ;;  %v510_v24 = vmul.f32 %v1703_v40, %v2503_v20 }
  0xce   : > { %v1307_v9 = vadd.f32 %v1279_v54, %v2328_v45  ;;  %v1188_v12 = vmul.f32 0.5, %v1160_v18  ;;  %v1078_v34 = vadd.f32 %v1050_v22, %v2651_v28  ;;  %v939_v4 = vadd.f32 %v747_v6, %v539_v38 }
  0xcf   : > { %v540_v3 = vadd.f32 %v510_v24, %v476_v11  ;;  %v576_v10 = vmul.f32 %v1715_v44, %v2582_v23  ;;  %v612_v13 = vmul.f32 %v1729_v50, %v2519_v42  ;;  %v680_v47 = vmul.f32 %v1731_v51, %v2590_v61 }
  0xd0   : > { %1486 = vst.msk [vmem:[%s1983_s21 + $0x90] sm:$0xff] %vm1320_vm4, %v1307_v9  ;;  %v1216_v45 = vmul.f32 %v1188_v12, %v2562_v48  ;;  %v1106_v20 = vmul.f32 0.7978846, %v1078_v34  ;;  %v2708_v38 = vadd.f32 %v939_v4, %v911_v25  ;;  %v784_v5 = vmul.f32 %v1747_v62, %v2673_v53 }
  0xd1   : > { %v644_v49 = vadd.f32 %v612_v13, %v576_v10  ;;  %v818_v33 = vmul.f32 %v1749_v63, %v2617_v17  ;;  %v882_v16 = vmul.f32 %v1737_v56, %v2687_v43  ;;  %v196_v57 = vrot.slane %v2694_v35, 7 }
  0xd2   : > { %v1248_v26 = vmul.f32 %v1743_v59, %v1216_v45  ;;  %1550 = vtanh.f32 %v1106_v20  ;;  %v995_v48 = vmul.f32 %v2708_v38, %v2708_v38  ;;  %v212_v15 = vrot.slane %v2703_v0, 7 }
  0xd3   : > { %v712_v54 = vadd.f32 %v680_v47, %v644_v49  ;;  %v848_v18 = vadd.f32 %v818_v33, %v784_v5  ;;  %v299_v22 = vrot.slane %v2694_v35, 1  ;;  %v315_v6 = vrot.slane %v2703_v0, 1 }
  0xd4   : > { %v1280_v25 = vadd.f32 %v1745_v60, %v1248_v26  ;;  %v1023_v11 = vmul.f32 %v995_v48, %v2708_v38  ;;  %v245_v24 = vsel %vm215_vm1, %v212_v15, %v196_v57  ;;  %v413_v9 = vmul.f32 %v1659_v19, %v2546_v14 }
  0xd5   : > { %v1549_v12 = vpop.eup %1548  ;;  %v748_v34 = vadd.f32 %v1733_v52, %v712_v54  ;;  %v912_v4 = vadd.f32 %v882_v16, %v848_v18  ;;  %v2732_v10 = vsel %vm181_vm0, 0.0, %v245_v24  ;;  %v2736_v13 = vsel %vm318_vm2, %v299_v22, %v315_v6 }
  0xd6   : > { %v1308_v47 = vadd.f32 %v1280_v25, %v2335_v27  ;;  %v1161_v45 = vadd.f32 1.0, %v1549_v12  ;;  %v1051_v20 = vmul.f32 0.044715, %v1023_v11  ;;  %v447_v5 = vmul.f32 %v1701_v39, %v2513_v30 }
  0xd7   : > { %v940_v14 = vadd.f32 %v748_v34, %v540_v3  ;;  %v511_v49 = vmul.f32 %v1703_v40, %v2550_v7  ;;  %v577_v33 = vmul.f32 %v1715_v44, %v2640_v46  ;;  %v613_v16 = vmul.f32 %v1729_v50, %v2606_v36 }
  0xd8   : > { %1487 = vst.msk [vmem:[%s1983_s21 + $0x98] sm:$0xff] %vm1320_vm4, %v1308_v47  ;;  %v1189_v26 = vmul.f32 0.5, %v1161_v45  ;;  %v1079_v27 = vadd.f32 %v1051_v20, %v2708_v38  ;;  %v477_v48 = vadd.f32 %v447_v5, %v413_v9  ;;  %v681_v54 = vmul.f32 %v1731_v51, %v2644_v55 }
  0xd9   : > { %v2752_v18 = vadd.f32 %v940_v14, %v912_v4  ;;  %v645_v3 = vadd.f32 %v613_v16, %v577_v33  ;;  %v785_v7 = vmul.f32 %v1747_v62, %v2732_v10  ;;  %v819_v25 = vmul.f32 %v1749_v63, %v2694_v35 }
  0xda   : > { %v1217_v11 = vmul.f32 %v1189_v26, %v2620_v21  ;;  %v1107_v24 = vmul.f32 0.7978846, %v1079_v27  ;;  %v541_v12 = vadd.f32 %v511_v49, %v477_v48  ;;  %v883_v34 = vmul.f32 %v1737_v56, %v2736_v13 }
  0xdb   : > { %v996_v9 = vmul.f32 %v2752_v18, %v2752_v18  ;;  %v713_v47 = vadd.f32 %v681_v54, %v645_v3  ;;  %v849_v4 = vadd.f32 %v819_v25, %v785_v7  ;;  %v2765_v45 = vsel %vm215_vm1, %v196_v57, %v212_v15 }
  0xdc   : > { %v1551_v20 = vpop.eup %1550  ;;  %v1249_v5 = vmul.f32 %v1743_v59, %v1217_v11  ;;  %1552 = vtanh.f32 %v1107_v24  ;;  %v348_v21 = vsel %vm318_vm2, %v315_v6, %v299_v22  ;;  %v414_v14 = vmul.f32 %v1659_v19, %v2582_v23  ;;  %v2791_v24 = vld [vmem:[%s1626_s14 + $0xe0] sm:$0xff] }
  0xdd   : > { %v1162_v49 = vadd.f32 1.0, %v1551_v20  ;;  %v1024_v33 = vmul.f32 %v996_v9, %v2752_v18  ;;  %v749_v16 = vadd.f32 %v1733_v52, %v713_v47  ;;  %v913_v26 = vadd.f32 %v883_v34, %v849_v4  ;;  %v2800_v47 = vld [vmem:[%s1626_s14 + $0xe8] sm:$0xff] }
  0xde   : > { %v1281_v57 = vadd.f32 %v1745_v60, %v1249_v5  ;;  %v2777_v15 = vsel %vm285_vm3, 0.0, %v348_v21  ;;  %v448_v22 = vmul.f32 %v1701_v39, %v2519_v42  ;;  %v512_v23 = vmul.f32 %v1703_v40, %v2590_v61 }
  0xdf   : > { %v1190_v6 = vmul.f32 0.5, %v1162_v49  ;;  %v1052_v27 = vmul.f32 0.044715, %v1024_v33  ;;  %v941_v48 = vadd.f32 %v749_v16, %v541_v12  ;;  %v578_v54 = vmul.f32 %v1715_v44, %v2673_v53 }
  0xe0   : > { %v1309_v3 = vadd.f32 %v1281_v57, %v2423_v58  ;;  %v478_v7 = vadd.f32 %v448_v22, %v414_v14  ;;  %v614_v25 = vmul.f32 %v1729_v50, %v2617_v17  ;;  %v682_v11 = vmul.f32 %v1731_v51, %v2687_v43 }
  0xe1   : > { %v1218_v34 = vmul.f32 %v1190_v6, %v2651_v28  ;;  %v1080_v61 = vadd.f32 %v1052_v27, %v2752_v18  ;;  %v2795_v9 = vadd.f32 %v941_v48, %v913_v26  ;;  %v786_v12 = vmul.f32 %v1747_v62, %v2765_v45 }
  0xe2   : > { %1488 = vst.msk [vmem:[%s1983_s21 + $0xa0] sm:$0xff] %vm1320_vm4, %v1309_v3  ;;  %v542_v58 = vadd.f32 %v512_v23, %v478_v7  ;;  %v646_v4 = vadd.f32 %v614_v25, %v578_v54  ;;  %v820_v20 = vmul.f32 %v1749_v63, %v2703_v0  ;;  %v884_v5 = vmul.f32 %v1737_v56, %v2777_v15 }
  0xe3   : > { %v1250_v28 = vmul.f32 %v1743_v59, %v1218_v34  ;;  %v1108_v21 = vmul.f32 0.7978846, %v1080_v61  ;;  %v997_v14 = vmul.f32 %v2795_v9, %v2795_v9  ;;  %v197_v49 = vrot.slane %v2791_v24, 7 }
  0xe4   : > { %v714_v33 = vadd.f32 %v682_v11, %v646_v4  ;;  %v850_v16 = vadd.f32 %v820_v20, %v786_v12  ;;  %v213_v26 = vrot.slane %v2800_v47, 7  ;;  %v300_v57 = vrot.slane %v2791_v24, 1 }
  0xe5   : > { %v1282_v22 = vadd.f32 %v1745_v60, %v1250_v28  ;;  %1554 = vtanh.f32 %v1108_v21  ;;  %v1025_v23 = vmul.f32 %v997_v14, %v2795_v9  ;;  %v316_v6 = vrot.slane %v2800_v47, 1 }
  0xe6   : > { %v1553_v27 = vpop.eup %1552  ;;  %v750_v48 = vadd.f32 %v1733_v52, %v714_v33  ;;  %v914_v54 = vadd.f32 %v884_v5, %v850_v16  ;;  %v246_v3 = vsel %vm215_vm1, %v213_v26, %v197_v49  ;;  %v415_v7 = vmul.f32 %v1659_v19, %v2640_v46 }
  0xe7   : > { %v1310_v25 = vadd.f32 %v1282_v22, %v2432_v29  ;;  %v1163_v11 = vadd.f32 1.0, %v1553_v27  ;;  %v1053_v34 = vmul.f32 0.044715, %v1025_v23  ;;  %v2825_v61 = vsel %vm181_vm0, 0.0, %v246_v3 }
  0xe8   : > { %v942_v12 = vadd.f32 %v750_v48, %v542_v58  ;;  %v2829_v4 = vsel %vm318_vm2, %v300_v57, %v316_v6  ;;  %v449_v20 = vmul.f32 %v1701_v39, %v2606_v36  ;;  %v513_v5 = vmul.f32 %v1703_v40, %v2644_v55 }
  0xe9   : > { %1489 = vst.msk [vmem:[%s1983_s21 + $0xa8] sm:$0xff] %vm1320_vm4, %v1310_v25  ;;  %v1191_v29 = vmul.f32 0.5, %v1163_v11  ;;  %v1081_v46 = vadd.f32 %v1053_v34, %v2795_v9  ;;  %v579_v28 = vmul.f32 %v1715_v44, %v2732_v10  ;;  %v615_v58 = vmul.f32 %v1729_v50, %v2694_v35 }
  0xea   : > { %v2842_v21 = vadd.f32 %v942_v12, %v914_v54  ;;  %v479_v14 = vadd.f32 %v449_v20, %v415_v7  ;;  %v683_v33 = vmul.f32 %v1731_v51, %v2736_v13  ;;  %v787_v55 = vmul.f32 %v1747_v62, %v2825_v61 }
  0xeb   : > { %v1219_v16 = vmul.f32 %v1191_v29, %v2708_v38  ;;  %v1109_v22 = vmul.f32 0.7978846, %v1081_v46  ;;  %v647_v23 = vadd.f32 %v615_v58, %v579_v28  ;;  %v821_v27 = vmul.f32 %v1749_v63, %v2791_v24 }
  0xec   : > { %v998_v48 = vmul.f32 %v2842_v21, %v2842_v21  ;;  %v543_v3 = vadd.f32 %v513_v5, %v479_v14  ;;  %v885_v54 = vmul.f32 %v1737_v56, %v2829_v4  ;;  %v2857_v7 = vsel %vm215_vm1, %v197_v49, %v213_v26 }
  0xed   : > { %v1251_v25 = vmul.f32 %v1743_v59, %v1219_v16  ;;  %1556 = vtanh.f32 %v1109_v22  ;;  %v715_v38 = vadd.f32 %v683_v33, %v647_v23  ;;  %v851_v11 = vadd.f32 %v821_v27, %v787_v55  ;;  %v2881_v22 = vld [vmem:[%s1626_s14 + $0xf0] sm:$0xff] }
  0xee   : > { %v1026_v34 = vmul.f32 %v998_v48, %v2842_v21  ;;  %v349_v12 = vsel %vm318_vm2, %v316_v6, %v300_v57  ;;  %v416_v20 = vmul.f32 %v1659_v19, %v2673_v53  ;;  %v450_v5 = vmul.f32 %v1701_v39, %v2617_v17 }
  0xef   : > { %v1555_v29 = vpop.eup %1554  ;;  %v1283_v49 = vadd.f32 %v1745_v60, %v1251_v25  ;;  %v751_v26 = vadd.f32 %v1733_v52, %v715_v38  ;;  %v915_v46 = vadd.f32 %v885_v54, %v851_v11  ;;  %v2871_v28 = vsel %vm285_vm3, 0.0, %v349_v12  ;;  %v2887_v25 = vld [vmem:[%s1626_s14 + $0xf8] sm:$0xff] }
  0xf0   : > { %v1164_v57 = vadd.f32 1.0, %v1555_v29  ;;  %v1054_v6 = vmul.f32 0.044715, %v1026_v34  ;;  %v480_v58 = vadd.f32 %v450_v5, %v416_v20  ;;  %v514_v53 = vmul.f32 %v1703_v40, %v2687_v43 }
  0xf1   : > { %v1311_v14 = vadd.f32 %v1283_v49, %v2513_v30  ;;  %v943_v33 = vadd.f32 %v751_v26, %v543_v3  ;;  %v580_v55 = vmul.f32 %v1715_v44, %v2765_v45  ;;  %v616_v16 = vmul.f32 %v1729_v50, %v2703_v0 }
  0xf2   : > { %v1192_v23 = vmul.f32 0.5, %v1164_v57  ;;  %v1082_v27 = vadd.f32 %v1054_v6, %v2842_v21  ;;  %v544_v48 = vadd.f32 %v514_v53, %v480_v58  ;;  %v684_v54 = vmul.f32 %v1731_v51, %v2777_v15 }
  0xf3   : > { %1490 = vst.msk [vmem:[%s1983_s21 + $0xb0] sm:$0xff] %vm1320_vm4, %v1311_v14  ;;  %v2891_v30 = vadd.f32 %v943_v33, %v915_v46  ;;  %v648_v43 = vadd.f32 %v616_v16, %v580_v55  ;;  %v788_v3 = vmul.f32 %v1747_v62, %v2857_v7  ;;  %v822_v38 = vmul.f32 %v1749_v63, %v2800_v47 }
  0xf4   : > { %v1220_v11 = vmul.f32 %v1192_v23, %v2752_v18  ;;  %v1110_v34 = vmul.f32 0.7978846, %v1082_v27  ;;  %v886_v12 = vmul.f32 %v1737_v56, %v2871_v28  ;;  %v198_v20 = vrot.slane %v2881_v22, 7 }
  0xf5   : > { %v999_v5 = vmul.f32 %v2891_v30, %v2891_v30  ;;  %v716_v29 = vadd.f32 %v684_v54, %v648_v43  ;;  %v852_v49 = vadd.f32 %v822_v38, %v788_v3  ;;  %v214_v26 = vrot.slane %v2887_v25, 7 }
  0xf6   : > { %v1252_v46 = vmul.f32 %v1743_v59, %v1220_v11  ;;  %1558 = vtanh.f32 %v1110_v34  ;;  %v301_v57 = vrot.slane %v2881_v22, 1  ;;  %v317_v18 = vrot.slane %v2887_v25, 1 }
  0xf7   : > { %v1557_v6 = vpop.eup %1556  ;;  %v1027_v58 = vmul.f32 %v999_v5, %v2891_v30  ;;  %v752_v53 = vadd.f32 %v1733_v52, %v716_v29  ;;  %v916_v14 = vadd.f32 %v886_v12, %v852_v49  ;;  %v247_v33 = vsel %vm215_vm1, %v214_v26, %v198_v20 }
  0xf8   : > { %v1284_v55 = vadd.f32 %v1745_v60, %v1252_v46  ;;  %v1165_v16 = vadd.f32 1.0, %v1557_v6  ;;  %v2914_v23 = vsel %vm181_vm0, 0.0, %v247_v33  ;;  %v2918_v27 = vsel %vm318_vm2, %v301_v57, %v317_v18 }
  0xf9   : > { %v1055_v54 = vmul.f32 0.044715, %v1027_v58  ;;  %v944_v43 = vadd.f32 %v752_v53, %v544_v48  ;;  %v417_v3 = vmul.f32 %v1659_v19, %v2732_v10  ;;  %v451_v38 = vmul.f32 %v1701_v39, %v2694_v35 }
  0xfa   : > { %v1312_v11 = vadd.f32 %v1284_v55, %v2519_v42  ;;  %v1193_v34 = vmul.f32 0.5, %v1165_v16  ;;  %v515_v12 = vmul.f32 %v1703_v40, %v2736_v13  ;;  %v581_v5 = vmul.f32 %v1715_v44, %v2825_v61 }
  0xfb   : > { %v1083_v29 = vadd.f32 %v1055_v54, %v2891_v30  ;;  %v2930_v49 = vadd.f32 %v944_v43, %v916_v14  ;;  %v481_v48 = vadd.f32 %v451_v38, %v417_v3  ;;  %v617_v10 = vmul.f32 %v1729_v50, %v2791_v24 }
  0xfc   : > { %1491 = vst.msk [vmem:[%s1983_s21 + $0xb8] sm:$0xff] %vm1320_vm4, %v1312_v11  ;;  %v1221_v46 = vmul.f32 %v1193_v34, %v2795_v9  ;;  %v685_v42 = vmul.f32 %v1731_v51, %v2829_v4  ;;  %v789_v13 = vmul.f32 %v1747_v62, %v2914_v23  ;;  %v823_v6 = vmul.f32 %v1749_v63, %v2881_v22 }
  0xfd   : > { %v1111_v58 = vmul.f32 0.7978846, %v1083_v29  ;;  %v1000_v53 = vmul.f32 %v2930_v49, %v2930_v49  ;;  %v545_v14 = vadd.f32 %v515_v12, %v481_v48  ;;  %v649_v33 = vadd.f32 %v617_v10, %v581_v5 }
  0xfe   : > { %v1253_v55 = vmul.f32 %v1743_v59, %v1221_v46  ;;  %v853_v16 = vadd.f32 %v823_v6, %v789_v13  ;;  %v887_v9 = vmul.f32 %v1737_v56, %v2918_v27  ;;  %v2950_v54 = vsel %vm215_vm1, %v198_v20, %v214_v26 }
  0xff   : > { %1560 = vtanh.f32 %v1111_v58  ;;  %v1028_v43 = vmul.f32 %v1000_v53, %v2930_v49  ;;  %v717_v3 = vadd.f32 %v685_v42, %v649_v33  ;;  %v350_v38 = vsel %vm318_vm2, %v317_v18, %v301_v57 }
 0x100   : > { %v1559_v11 = vpop.eup %1558  ;;  %v1285_v34 = vadd.f32 %v1745_v60, %v1253_v55  ;;  %v917_v12 = vadd.f32 %v887_v9, %v853_v16  ;;  %v2958_v5 = vsel %vm285_vm3, 0.0, %v350_v38  ;;  %v418_v20 = vmul.f32 %v1659_v19, %v2765_v45 }
 0x101   : > { %v1166_v26 = vadd.f32 1.0, %v1559_v11  ;;  %v1056_v29 = vmul.f32 0.044715, %v1028_v43  ;;  %v753_v48 = vadd.f32 %v1733_v52, %v717_v3  ;;  %v452_v1 = vmul.f32 %v1701_v39, %v2703_v0 }
 0x102   : > { %v1313_v57 = vadd.f32 %v1285_v34, %v2606_v36  ;;  %v516_v18 = vmul.f32 %v1703_v40, %v2777_v15  ;;  %v582_v2 = vmul.f32 %v1715_v44, %v2857_v7  ;;  %v618_v10 = vmul.f32 %v1729_v50, %v2800_v47  ;;  %v2992_v34 = vld [vmem:[%s1626_s14] sm:$0xff] }
 0x103   : > { %v1194_v46 = vmul.f32 0.5, %v1166_v26  ;;  %v1084_v45 = vadd.f32 %v1056_v29, %v2930_v49  ;;  %v945_v42 = vadd.f32 %v753_v48, %v545_v14  ;;  %v482_v13 = vadd.f32 %v452_v1, %v418_v20 }
 0x104   : > { %1492 = vst.msk [vmem:[%s1983_s21 + $0xc0] sm:$0xff] %vm1320_vm4, %v1313_v57  ;;  %v650_v6 = vadd.f32 %v618_v10, %v582_v2  ;;  %v686_v36 = vmul.f32 %v1731_v51, %v2871_v28  ;;  %v790_v15 = vmul.f32 %v1747_v62, %v2950_v54  ;;  %v824_v58 = vmul.f32 %v1749_v63, %v2887_v25 }
 0x105   : > { %v1222_v53 = vmul.f32 %v1194_v46, %v2842_v21  ;;  %v1112_v33 = vmul.f32 0.7978846, %v1084_v45  ;;  %v2982_v55 = vadd.f32 %v945_v42, %v917_v12  ;;  %v546_v14 = vadd.f32 %v516_v18, %v482_v13  ;;  %v3131_v45 = vld [vmem:[#allocation4_spill] sm:$0xff] }
 0x106   : > { %v718_v16 = vadd.f32 %v686_v36, %v650_v6  ;;  %v854_v9 = vadd.f32 %v824_v58, %v790_v15  ;;  %v888_v43 = vmul.f32 %v1737_v56, %v2958_v5  ;;  %v553_v3 = vmul.f32 %v1715_v44, %v1680_v31  ;;  %v3010_v6 = vld [vmem:[%s1626_s14 + $0x8] sm:$0xff] }
 0x107   : > { %v1254_v38 = vmul.f32 %v1743_v59, %v1222_v53  ;;  %1562 = vtanh.f32 %v1112_v33  ;;  %v1001_v11 = vmul.f32 %v2982_v55, %v2982_v55  ;;  %v589_v21 = vmul.f32 %v2992_v34, %v1729_v50  ;;  %v3132_v53 = vld [vmem:[#allocation5_spill] sm:$0xff] }
 0x108   : > { %v754_v12 = vadd.f32 %v1733_v52, %v718_v16  ;;  %v918_v20 = vadd.f32 %v888_v43, %v854_v9  ;;  %v657_v26 = vmul.f32 %v1731_v51, %v1697_v37  ;;  %v761_v31 = vmul.f32 %v1747_v62, %v1684_v32  ;;  %v3133_v16 = vld [vmem:[#allocation2_spill] sm:$0xff] }
 0x109   : > { %v1561_v29 = vpop.eup %1560  ;;  %v1286_v48 = vadd.f32 %v1745_v60, %v1254_v38  ;;  %v1029_v1 = vmul.f32 %v1001_v11, %v2982_v55  ;;  %v621_v57 = vadd.f32 %v589_v21, %v553_v3  ;;  %v859_v18 = vmul.f32 %v1737_v56, %v1707_v41  ;;  %v1578_v38 = vld [vmem:[%s1626_s14 + $0x18] sm:$0xff]  ;;  %v3134_v21 = vld [vmem:[#allocation3_spill] sm:$0xff] }
 0x10a   : > { %v1167_v2 = vadd.f32 1.0, %v1561_v29  ;;  %v946_v10 = vadd.f32 %v754_v12, %v546_v14  ;;  %v825_v46 = vadd.f32 %v1767_v8, %v761_v31  ;;  %v554_v37 = vmul.f32 %v1715_v44, %v3131_v45 }
 0x10b   : > { %v1314_v42 = vadd.f32 %v1286_v48, %v2617_v17  ;;  %v1057_v32 = vmul.f32 0.044715, %v1029_v1  ;;  %v689_v13 = vadd.f32 %v657_v26, %v621_v57  ;;  %v590_v36 = vmul.f32 %v3010_v6, %v1729_v50 }
 0x10c   : > { %v1195_v15 = vmul.f32 0.5, %v1167_v2  ;;  %v3014_v58 = vadd.f32 %v946_v10, %v918_v20  ;;  %v889_v41 = vadd.f32 %v859_v18, %v825_v46  ;;  %v658_v8 = vmul.f32 %v1731_v51, %v3132_v53 }
 0x10d   : > { %1493 = vst.msk [vmem:[%s1983_s21 + $0xc8] sm:$0xff] %vm1320_vm4, %v1314_v42  ;;  %v1085_v33 = vadd.f32 %v1057_v32, %v2982_v55  ;;  %v725_v17 = vadd.f32 %v1733_v52, %v689_v13  ;;  %v622_v14 = vadd.f32 %v590_v36, %v554_v37  ;;  %v762_v9 = vmul.f32 %v1747_v62, %v3133_v16 }
 0x10e   : > { %v1223_v43 = vmul.f32 %v1195_v15, %v2891_v30  ;;  %v1002_v3 = vmul.f32 %v3014_v58, %v3014_v58  ;;  %v796_v11 = vmul.f32 %v1578_v38, %v1749_v63  ;;  %v860_v12 = vmul.f32 %v1737_v56, %v3134_v21 }
 0x10f   : > { %v1113_v20 = vmul.f32 0.7978846, %v1085_v33  ;;  %v3031_v26 = vadd.f32 %v889_v41, %v725_v17  ;;  %v690_v31 = vadd.f32 %v658_v8, %v622_v14  ;;  %v419_v29 = vmul.f32 %v1659_v19, %v2825_v61 }
 0x110   : > { %v1255_v62 = vmul.f32 %v1743_v59, %v1223_v43  ;;  %v1030_v30 = vmul.f32 %v1002_v3, %v3014_v58  ;;  %v826_v48 = vadd.f32 %v796_v11, %v762_v9  ;;  %v453_v1 = vmul.f32 %v1701_v39, %v2791_v24 }
 0x111   : > { %v1563_v57 = vpop.eup %1562  ;;  %1564 = vtanh.f32 %v1113_v20  ;;  %v1351_v56 = vmul.f32 %v3031_v26, %v3031_v26  ;;  %v726_v63 = vadd.f32 %v1733_v52, %v690_v31  ;;  %v517_v18 = vmul.f32 %v1703_v40, %v2829_v4 }
 0x112   : > { %v1287_v61 = vadd.f32 %v1745_v60, %v1255_v62  ;;  %v1168_v2 = vadd.f32 1.0, %v1563_v57  ;;  %v1058_v10 = vmul.f32 0.044715, %v1030_v30  ;;  %v890_v46 = vadd.f32 %v860_v12, %v826_v48 }
 0x113   : > { %v1353_v45 = vmul.f32 %v1351_v56, %v3031_v26  ;;  %v483_v37 = vadd.f32 %v453_v1, %v419_v29  ;;  %v583_v42 = vmul.f32 %v1715_v44, %v2914_v23  ;;  %v619_v32 = vmul.f32 %v1729_v50, %v2881_v22 }
 0x114   : > { %v1315_v13 = vadd.f32 %v1287_v61, %v2694_v35  ;;  %v1196_v36 = vmul.f32 0.5, %v1168_v2  ;;  %v1086_v4 = vadd.f32 %v1058_v10, %v3014_v58  ;;  %v3052_v15 = vadd.f32 %v890_v46, %v726_v63 }
 0x115   : > { %v1355_v41 = vmul.f32 0.044715, %v1353_v45  ;;  %v547_v53 = vadd.f32 %v517_v18, %v483_v37  ;;  %v651_v8 = vadd.f32 %v619_v32, %v583_v42  ;;  %v687_v33 = vmul.f32 %v1731_v51, %v2918_v27 }
 0x116   : > { %1494 = vst.msk [vmem:[%s1983_s21 + $0xd0] sm:$0xff] %vm1320_vm4, %v1315_v13  ;;  %v1224_v23 = vmul.f32 %v1196_v36, %v2930_v49  ;;  %v1114_v17 = vmul.f32 0.7978846, %v1086_v4  ;;  %v1352_v14 = vmul.f32 %v3052_v15, %v3052_v15  ;;  %v420_v35 = vmul.f32 %v1659_v19, %v2857_v7 }
 0x117   : > { %v1357_v16 = vadd.f32 %v1355_v41, %v3031_v26  ;;  %v719_v9 = vadd.f32 %v687_v33, %v651_v8  ;;  %v454_v43 = vmul.f32 %v1701_v39, %v2800_v47  ;;  %v518_v27 = vmul.f32 %v1703_v40, %v2871_v28 }
 0x118   : > { %v1256_v3 = vmul.f32 %v1743_v59, %v1224_v23  ;;  %1566 = vtanh.f32 %v1114_v17  ;;  %v1354_v49 = vmul.f32 %v1352_v14, %v3052_v15  ;;  %v584_v38 = vmul.f32 %v1715_v44, %v2950_v54 }
 0x119   : > { %v1359_v11 = vmul.f32 0.7978846, %v1357_v16  ;;  %v755_v19 = vadd.f32 %v1733_v52, %v719_v9  ;;  %v484_v7 = vadd.f32 %v454_v43, %v420_v35  ;;  %v620_v21 = vmul.f32 %v1729_v50, %v2887_v25 }
 0x11a   : > { %v1288_v39 = vadd.f32 %v1745_v60, %v1256_v3  ;;  %v1356_v12 = vmul.f32 0.044715, %v1354_v49  ;;  %v688_v40 = vmul.f32 %v1731_v51, %v2958_v5 }
 0x11b   : > { %v1565_v28 = vpop.eup %1564  ;;  %1568 = vtanh.f32 %v1359_v11  ;;  %v1377_v20 = vadd.f32 %v755_v19, %v547_v53  ;;  %v652_v31 = vadd.f32 %v620_v21, %v584_v38  ;;  %v548_v30 = vadd.f32 %v518_v27, %v484_v7 }
 0x11c   : > { %v1316_v44 = vadd.f32 %v1288_v39, %v2703_v0  ;;  %v1169_v54 = vadd.f32 1.0, %v1565_v28  ;;  %v1358_v29 = vadd.f32 %v1356_v12, %v3052_v15 }
 0x11d   : > { %v1379_v62 = vmul.f32 %v1377_v20, %v1377_v20  ;;  %v720_v48 = vadd.f32 %v688_v40, %v652_v31 }
 0x11e   : > { %1495 = vst.msk [vmem:[%s1983_s21 + $0xd8] sm:$0xff] %vm1320_vm4, %v1316_v44  ;;  %v1197_v50 = vmul.f32 0.5, %v1169_v54  ;;  %v1360_v1 = vmul.f32 0.7978846, %v1358_v29 }
 0x11f   : > { %v1381_v57 = vmul.f32 %v1379_v62, %v1377_v20  ;;  %v756_v56 = vadd.f32 %v1733_v52, %v720_v48 }
 0x120   : > { %v1225_v51 = vmul.f32 %v1197_v50, %v2982_v55  ;;  %1570 = vtanh.f32 %v1360_v1 }
 0x121   : > { %v1383_v5 = vmul.f32 0.044715, %v1381_v57  ;;  %v1378_v63 = vadd.f32 %v756_v56, %v548_v30 }
 0x122   : > { %v1567_v0 = vpop.eup %1566  ;;  %v1257_v18 = vmul.f32 %v1743_v59, %v1225_v51 }
 0x123   : > { %v1170_v61 = vadd.f32 1.0, %v1567_v0  ;;  %v1385_v2 = vadd.f32 %v1383_v5, %v1377_v20  ;;  %v1380_v10 = vmul.f32 %v1378_v63, %v1378_v63 }
 0x124   : > { %v1289_v46 = vadd.f32 %v1745_v60, %v1257_v18 }
 0x125   : > { %v1569_v45 = vpop.eup %1568  ;;  %v1198_v37 = vmul.f32 0.5, %v1170_v61  ;;  %v1387_v42 = vmul.f32 0.7978846, %v1385_v2  ;;  %v1382_v32 = vmul.f32 %v1380_v10, %v1378_v63 }
 0x126   : > { %v1317_v52 = vadd.f32 %v1289_v46, %v2791_v24  ;;  %v1363_v13 = vadd.f32 1.0, %v1569_v45 }
 0x127   : > { %v1226_v55 = vmul.f32 %v1198_v37, %v3014_v58  ;;  %1572 = vtanh.f32 %v1387_v42  ;;  %v1384_v36 = vmul.f32 0.044715, %v1382_v32 }
 0x128   : > { %1496 = vst.msk [vmem:[%s1983_s21 + $0xe0] sm:$0xff] %vm1320_vm4, %v1317_v52  ;;  %v1365_v4 = vmul.f32 0.5, %v1363_v13 }
 0x129   : > { %v1258_v41 = vmul.f32 %v1743_v59, %v1226_v55  ;;  %v1386_v53 = vadd.f32 %v1384_v36, %v1378_v63 }
 0x12a   : > { %v1571_v8 = vpop.eup %1570  ;;  %v1367_v33 = vmul.f32 %v1365_v4, %v3031_v26 }
 0x12b   : > { %v1290_v23 = vadd.f32 %v1745_v60, %v1258_v41  ;;  %v1364_v17 = vadd.f32 1.0, %v1571_v8  ;;  %v1388_v24 = vmul.f32 0.7978846, %v1386_v53 }
 0x12c   : > { %v1369_v14 = vmul.f32 %v1367_v33, %v1743_v59 }
 0x12d   : > { %v1318_v58 = vadd.f32 %v1290_v23, %v2800_v47  ;;  %v1366_v35 = vmul.f32 0.5, %v1364_v17  ;;  %1574 = vtanh.f32 %v1388_v24 }
 0x12e   : > { %v1371_v16 = vadd.f32 %v1369_v14, %v1745_v60 }
 0x12f   : > { %1497 = vst.msk [vmem:[%s1983_s21 + $0xe8] sm:$0xff] %vm1320_vm4, %v1318_v58  ;;  %v1368_v9 = vmul.f32 %v1366_v35, %v3052_v15 }
 0x130   : > { %v1373_v43 = vadd.f32 %v2992_v34, %v1371_v16 }
 0x131   : > { %v1573_v26 = vpop.eup %1572  ;;  %v1370_v27 = vmul.f32 %v1368_v9, %v1743_v59 }
 0x132   : > { %1375 = vst.msk [vmem:[%s1983_s21] sm:$0xff] %vm1320_vm4, %v1373_v43  ;;  %v1391_v3 = vadd.f32 1.0, %v1573_v26 }
 0x133   : > { %v1372_v47 = vadd.f32 %v1370_v27, %v1745_v60 }
 0x134   : > { %v1393_v49 = vmul.f32 0.5, %v1391_v3 }
 0x135   : > { %v1374_v38 = vadd.f32 %v3010_v6, %v1372_v47 }
 0x136   : > { %v1395_v11 = vmul.f32 %v1393_v49, %v1377_v20 }
 0x137   : > { %v1575_v19 = vpop.eup %1574  ;;  %1376 = vst.msk [vmem:[%s1983_s21 + $0x8] sm:$0xff] %vm1320_vm4, %v1374_v38 }
 0x138   : > { %v1397_v15 = vmul.f32 %v1395_v11, %v1743_v59  ;;  %v1392_v34 = vadd.f32 1.0, %v1575_v19 }
 0x13a   : > { %v1399_v7 = vadd.f32 %v1397_v15, %v1745_v60  ;;  %v1394_v21 = vmul.f32 0.5, %v1392_v34 }
 0x13c   : > { %v1401_v39 = vadd.f32 %v1399_v7, %v2881_v22  ;;  %v1396_v12 = vmul.f32 %v1394_v21, %v1378_v63 }
 0x13e   : > { %1498 = vst.msk [vmem:[%s1983_s21 + $0xf0] sm:$0xff] %vm1320_vm4, %v1401_v39  ;;  %v1398_v40 = vmul.f32 %v1396_v12, %v1743_v59 }
 0x140   : > { %v1400_v28 = vadd.f32 %v1398_v40, %v1745_v60 }
 0x142   : > { %v1402_v6 = vadd.f32 %v1400_v28, %v2887_v25 }
 0x144   : > { %1499 = vst.msk [vmem:[%s1983_s21 + $0xf8] sm:$0xff] %vm1320_vm4, %v1402_v6 }
 0x145 PF: > { %s12_s9 = sadd.s32 1, %s1585_s9  }
 0x146   : > { %p9_p4 = scmp.ge.s32.totalorder %s12_s9, 4  }
 0x148   :  { %11 = sbr.rel (!%p9_p4) target bundleno = 1 (0x1), region = 60 }

</bundles_post_ra>
